<compile_context>
chip_gen: v6e
topology: v6e:2x2x1
jax: 0.10.0
libtpu: 0.0.40
codegen_flags: <defaults>
</compile_context>

<pallas_src>
import functools

import jax
import jax.numpy as jnp
from jax.experimental import pallas as pl
from jax.experimental.pallas import tpu as pltpu


# ----------------------------------------------------------------------------
# Fused kernel: one grid step processes `B = bblk` images end-to-end.
# ----------------------------------------------------------------------------

def _unet_kernel(p1_ref, w1_ref, b1_ref, w2_ref, b2_ref, wt_ref, bt_ref,
                 o_ref, pp_ref):
    # p1_ref : (M, 48)       bf16  conv1 im2col patches (row = coarse 8x8 pixel)
    # w1_ref : (48, 256)     bf16  conv1 folded with the 4 maxpool taps
    # b1_ref : (1, 256)      f32
    # w2_ref : (9, 64, 128)  bf16  conv2 split into 9 per-tap slabs
    # b2_ref : (1, 128)      f32
    # wt_ref : (128, 256)    bf16  convT 2x2 taps concatenated in lanes
    # bt_ref : (1, 256)      f32
    # o_ref  : (M, 256)      f32   convT+ReLU output, lanes = (di, dj, cout)
    # pp_ref : (B, 10, 10, 64) f32 scratch: zero-padded pooled activations
    B = pp_ref.shape[0]
    M = B * 64                                   # rows = coarse (8x8) pixels

    # ---- Conv1(3->64, 3x3, pad=1) + ReLU + MaxPool(2): one K=48, N=256 matmul ----
    y1 = jnp.dot(p1_ref[...], w1_ref[...], preferred_element_type=jnp.float32)
    y1 = jnp.maximum(y1 + b1_ref[...], 0.0)      # (M, 256): 4 fine pixels x 64 ch
    m = jnp.maximum(y1[:, :128], y1[:, 128:])    # max over pool-row parity
    pooled = jnp.maximum(m[:, :64], m[:, 64:])   # (M, 64) = ReLU + maxpool

    # ---- Scatter pooled into the zero-padded scratch ------------------------------
    # Zero only the 1-pixel border each step (interior is fully rewritten below).
    zrow = jnp.zeros((B, 1, 10, 64), jnp.float32)
    zcol = jnp.zeros((B, 10, 1, 64), jnp.float32)
    pp_ref[:, 0:1, :, :] = zrow
    pp_ref[:, 9:10, :, :] = zrow
    pp_ref[:, :, 0:1, :] = zcol
    pp_ref[:, :, 9:10, :] = zcol
    pp_ref[:, 1:9, 1:9, :] = pooled.reshape(B, 8, 8, 64)

    # ---- Conv2(64->128, 3x3, pad=1) + ReLU: 9 accumulated (M,64)@(64,128) matmuls --
    acc = None
    for di in range(3):
        for dj in range(3):
            tap = pp_ref[:, di:di + 8, dj:dj + 8, :].reshape(M, 64)
            prod = jnp.dot(tap.astype(jnp.bfloat16), w2_ref[di * 3 + dj],
                           preferred_element_type=jnp.float32)
            acc = prod if acc is None else acc + prod
    y2 = jnp.maximum(acc + b2_ref[...], 0.0)     # (M, 128)

    # ---- ConvTranspose2d(128->64, k=2, s=2) + ReLU: one N=256 matmul --------------
    z = jnp.dot(y2.astype(jnp.bfloat16), wt_ref[...],
                preferred_element_type=jnp.float32)
    o_ref[...] = jnp.maximum(z + bt_ref[...], 0.0)   # (M, 256) lane-dense store


# ----------------------------------------------------------------------------
# Wrapper-side pre-packing (all tiny, runs once under jit).
# ----------------------------------------------------------------------------

def _prep_input(x_nchw):
    """NCHW (N,3,16,16) -> conv1+maxpool im2col patch matrix (N*64, 48), bf16.

    Row = coarse (8x8) output pixel (b, i, j); lane = (dI, dJ, dh, dw, c), the
    4x4 padded-input window (rows 2i..2i+3, cols 2j..2j+3) that produces all
    four pool-mates of that coarse pixel."""
    n = x_nchw.shape[0]
    x = jnp.transpose(x_nchw, (0, 2, 3, 1)).astype(jnp.float32)        # (N,16,16,3)
    xp = jnp.pad(x, ((0, 0), (1, 1), (1, 1), (0, 0)))                  # (N,18,18,3)
    xs = (xp.reshape(n, 9, 2, 9, 2, 3)
            .transpose(0, 1, 3, 2, 4, 5)
            .reshape(n, 9, 9, 12))                                     # lane=(dh,dw,c)
    slabs = []
    for dI in range(2):
        for dJ in range(2):
            slabs.append(xs[:, dI:dI + 8, dJ:dJ + 8, :].reshape(n * 64, 12))
    patch1 = jnp.concatenate(slabs, axis=1)                            # (N*64, 48)
    return patch1.astype(jnp.bfloat16)


def _prep_weights(params):
    f32, bf16 = jnp.float32, jnp.bfloat16

    # Conv1 folded with the 2x2 maxpool: 4x4 window -> 4 output "taps" x 64 ch.
    w1 = params["w1"]                                                  # (3,3,3,64)
    parts = []
    for a in range(2):
        for b in range(2):
            parts.append(jnp.pad(w1, ((a, 1 - a), (b, 1 - b), (0, 0), (0, 0))))
    w1nat = jnp.concatenate(parts, axis=-1)                            # (4,4,3,256)
    w1big = (w1nat.reshape(2, 2, 2, 2, 3, 256)
                  .transpose(0, 2, 1, 3, 4, 5)
                  .reshape(48, 256)).astype(bf16)
    b1big = jnp.tile(params["b1"], (1, 4)).astype(f32)                 # (1,256)

    w2slab = params["w2"].reshape(9, 64, 128).astype(bf16)             # per-tap slabs
    b2 = params["b2"].astype(f32)                                      # (1,128)

    wtc = (jnp.transpose(params["wt"], (2, 0, 1, 3))
              .reshape(128, 256)).astype(bf16)                         # (128,256)
    btt = jnp.tile(params["bt"], (1, 4)).astype(f32)                   # (1,256)

    return (w1big, b1big, w2slab, b2, wtc, btt)


def _pick_batch_block(n, max_blk=16):
    """Generation-aware batch packing (trace-time only).

    v5e/v6e (1 TensorCore): largest divisor of N -> one big MXU-filling step.
    v7x (2 TensorCores): prefer an even number of 'parallel' grid steps so both
    cores get work.  Capped at 16 so the per-step live set stays well under the
    default scoped-VMEM limit on every generation (incl. v5e's 16 MiB)."""
    try:
        kind = jax.devices()[0].device_kind.lower()
    except Exception:  # pragma: no cover - CPU fallback / interpret mode
        kind = ""
    two_cores = "v7" in kind
    if two_cores:
        for blk in range(min(max_blk, n), 0, -1):
            if n % blk == 0 and (n // blk) % 2 == 0:
                return blk
    for blk in range(min(max_blk, n), 0, -1):
        if n % blk == 0:
            return blk
    return 1


# ----------------------------------------------------------------------------
# SimpleUNet parameters + forward
# ----------------------------------------------------------------------------

def init_params(key):
    ks = jax.random.split(key, 8)
    s = 0.05
    return {
        # Conv2d(3, 64, 3, padding=1)
        "w1": jax.random.normal(ks[0], (3, 3, 3, 64), jnp.float32) * s,
        "b1": jax.random.normal(ks[1], (1, 64), jnp.float32) * s,
        # Conv2d(64, 128, 3, padding=1)
        "w2": jax.random.normal(ks[2], (3, 3, 64, 128), jnp.float32) * s,
        "b2": jax.random.normal(ks[3], (1, 128), jnp.float32) * s,
        # ConvTranspose2d(128, 64, 2, stride=2)
        "wt": jax.random.normal(ks[4], (2, 2, 128, 64), jnp.float32) * s,
        "bt": jax.random.normal(ks[5], (1, 64), jnp.float32) * s,
        # Conv2d(64, 1, 1)
        "w3": jax.random.normal(ks[6], (64, 1), jnp.float32) * s,
        "b3": jax.random.normal(ks[7], (1, 1), jnp.float32) * s,
    }


@jax.jit
def simple_unet_forward(x_nchw, params):
    n = x_nchw.shape[0]
    bblk = _pick_batch_block(n)

    patch1 = _prep_input(x_nchw)                 # (N*64, 48) bf16
    weights = _prep_weights(params)

    in_specs = [pl.BlockSpec((bblk * 64, 48), lambda nb: (nb, 0))]
    for w in weights:
        in_specs.append(
            pl.BlockSpec(w.shape,
                         functools.partial(lambda nb, nd: (0,) * nd, nd=w.ndim)))
    out_specs = pl.BlockSpec((bblk * 64, 256), lambda nb: (nb, 0))

    z = pl.pallas_call(
        _unet_kernel,
        out_shape=jax.ShapeDtypeStruct((n * 64, 256), jnp.float32),
        grid_spec=pltpu.PrefetchScalarGridSpec(
            num_scalar_prefetch=0,
            grid=(n // bblk,),
            in_specs=in_specs,
            out_specs=out_specs,
            scratch_shapes=[pltpu.VMEM((bblk, 10, 10, 64), jnp.float32)],
        ),
        compiler_params=pltpu.CompilerParams(
            dimension_semantics=("parallel",)),
    )(patch1, *weights)

    # Final Conv2d(64->1, 1x1) + stride-2 ConvTranspose tap interleave:
    # tiny lane-dense XLA epilogue on the (N*64, 256) kernel output.
    zz = z.reshape(n, 8, 8, 2, 2, 64)            # (b, i, j, di, dj, c)
    y = jnp.einsum("nijabc,co->nijabo", zz, params["w3"],
                   precision=jax.lax.Precision.HIGHEST)
    y = y + params["b3"].reshape(1, 1, 1, 1, 1, 1)
    out = (y.reshape(n, 8, 8, 2, 2)
             .transpose(0, 1, 3, 2, 4)           # (b, i, di, j, dj)
             .reshape(n, 1, 16, 16))
    return out


# ----------------------------------------------------------------------------
# Pure-JAX reference (correctness sanity check).
# ----------------------------------------------------------------------------

def _reference_forward(x_nchw, params):
    hi = jax.lax.Precision.HIGHEST
    dn = ("NHWC", "HWIO", "NHWC")
    x = jnp.transpose(x_nchw, (0, 2, 3, 1)).astype(jnp.float32)
    y = jax.lax.conv_general_dilated(x, params["w1"], (1, 1), "SAME",
                                     dimension_numbers=dn, precision=hi)
    y = jax.nn.relu(y + params["b1"].reshape(1, 1, 1, -1))
    n, h, w, c = y.shape
    y = y.reshape(n, h // 2, 2, w // 2, 2, c).max(axis=(2, 4))
    y = jax.lax.conv_general_dilated(y, params["w2"], (1, 1), "SAME",
                                     dimension_numbers=dn, precision=hi)
    y = jax.nn.relu(y + params["b2"].reshape(1, 1, 1, -1))
    # ConvTranspose2d(k=2, s=2): out[:, 2i+di, 2j+dj, :] = y[:, i, j, :] @ wt[di, dj] + bt
    t = jnp.einsum("nhwc,ijco->nhiwjo", y, params["wt"], precision=hi)
    n2, h2, _, w2_, _, co = t.shape
    y = t.reshape(n2, 2 * h2, 2 * w2_, co) + params["bt"].reshape(1, 1, 1, -1)
    y = jax.nn.relu(y)
    y = (jnp.einsum("nhwc,co->nhwo", y, params["w3"], precision=hi)
         + params["b3"].reshape(1, 1, 1, -1))
    return jnp.transpose(y, (0, 3, 1, 2))


if __name__ == "__main__":
    key = jax.random.PRNGKey(0)
    k_x, k_p = jax.random.split(key)

    # Small NCHW input consistent with Conv2d(3, ...) and even spatial dims.
    x = jax.random.normal(k_x, (2, 3, 16, 16), jnp.float32)
    params = init_params(k_p)

    out = simple_unet_forward(x, params)
    jax.block_until_ready(out)

    assert out.shape == (2, 1, 16, 16), out.shape
    assert out.dtype == jnp.float32

    ref = _reference_forward(x, params)
    max_err = float(jnp.max(jnp.abs(out - ref)))
    assert max_err < 2e-2, f"max abs err vs reference: {max_err}"

    print("KERNEL_OK")
</pallas_src>

<mosaic_0001>
module attributes {stable_mosaic.version = 11 : i64} {
  func.func @_unet_kernel(%arg0: i32, %arg1: memref<128x48xbf16, #tpu.memory_space<vmem>>, %arg2: memref<48x256xbf16, #tpu.memory_space<vmem>>, %arg3: memref<1x256xf32, #tpu.memory_space<vmem>>, %arg4: memref<9x64x128xbf16, #tpu.memory_space<vmem>>, %arg5: memref<1x128xf32, #tpu.memory_space<vmem>>, %arg6: memref<128x256xbf16, #tpu.memory_space<vmem>>, %arg7: memref<1x256xf32, #tpu.memory_space<vmem>>, %arg8: memref<128x256xf32, #tpu.memory_space<vmem>>, %arg9: memref<2x10x10x64xf32, #tpu.memory_space<vmem>>) attributes {dimension_semantics = [#tpu.dimension_semantics<parallel>], iteration_bounds = array<i64: 1>, scalar_prefetch = 0 : i64, scratch_operands = 1 : i64, tpu.core_type = #tpu.core_type<tc>, window_params = [{transform_indices = @transform_0, window_bounds = array<i64: 128, 48>}, {pipeline_mode = #tpu.pipeline_mode<synchronous>, transform_indices = @transform_1, window_bounds = array<i64: 48, 256>}, {pipeline_mode = #tpu.pipeline_mode<synchronous>, transform_indices = @transform_2, window_bounds = array<i64: 1, 256>}, {pipeline_mode = #tpu.pipeline_mode<synchronous>, transform_indices = @transform_3, window_bounds = array<i64: 9, 64, 128>}, {pipeline_mode = #tpu.pipeline_mode<synchronous>, transform_indices = @transform_4, window_bounds = array<i64: 1, 128>}, {pipeline_mode = #tpu.pipeline_mode<synchronous>, transform_indices = @transform_5, window_bounds = array<i64: 128, 256>}, {pipeline_mode = #tpu.pipeline_mode<synchronous>, transform_indices = @transform_6, window_bounds = array<i64: 1, 256>}, {transform_indices = @transform_7, window_bounds = array<i64: 128, 256>}]} {
    %c0 = arith.constant 0 : index
    %c0_0 = arith.constant 0 : index
    %0 = vector.load %arg1[%c0, %c0_0] : memref<128x48xbf16, #tpu.memory_space<vmem>>, vector<128x48xbf16>
    %c0_1 = arith.constant 0 : index
    %c0_2 = arith.constant 0 : index
    %1 = vector.load %arg2[%c0_1, %c0_2] : memref<48x256xbf16, #tpu.memory_space<vmem>>, vector<48x256xbf16>
    %cst = arith.constant dense<0.000000e+00> : vector<128x256xf32>
    %2 = tpu.matmul %0, %1, %cst {dimension_numbers = #tpu.dot_dimension_numbers<[1], [0], [0], [1], [0, 0, 1, 1], [], []>} : vector<128x48xbf16>, vector<48x256xbf16>, vector<128x256xf32> -> vector<128x256xf32>
    %c0_3 = arith.constant 0 : index
    %c0_4 = arith.constant 0 : index
    %3 = vector.load %arg3[%c0_3, %c0_4] : memref<1x256xf32, #tpu.memory_space<vmem>>, vector<1x256xf32>
    %4 = vector.broadcast %3 : vector<1x256xf32> to vector<128x256xf32>
    %5 = arith.addf %2, %4 : vector<128x256xf32>
    %cst_5 = arith.constant 0.000000e+00 : f32
    %6 = vector.broadcast %cst_5 : f32 to vector<128x256xf32>
    %7 = arith.maximumf %5, %6 : vector<128x256xf32>
    %8 = vector.extract_strided_slice %7 {offsets = [0, 0], sizes = [128, 128], strides = [1, 1]} : vector<128x256xf32> to vector<128x128xf32>
    %9 = vector.extract_strided_slice %7 {offsets = [0, 128], sizes = [128, 128], strides = [1, 1]} : vector<128x256xf32> to vector<128x128xf32>
    %10 = arith.maximumf %8, %9 : vector<128x128xf32>
    %11 = vector.extract_strided_slice %10 {offsets = [0, 0], sizes = [128, 64], strides = [1, 1]} : vector<128x128xf32> to vector<128x64xf32>
    %12 = vector.extract_strided_slice %10 {offsets = [0, 64], sizes = [128, 64], strides = [1, 1]} : vector<128x128xf32> to vector<128x64xf32>
    %13 = arith.maximumf %11, %12 : vector<128x64xf32>
    %cst_6 = arith.constant 0.000000e+00 : f32
    %14 = vector.broadcast %cst_6 : f32 to vector<2x1x10x64xf32>
    %cst_7 = arith.constant 0.000000e+00 : f32
    %15 = vector.broadcast %cst_7 : f32 to vector<2x10x1x64xf32>
    %c0_8 = arith.constant 0 : index
    %c0_9 = arith.constant 0 : index
    %c0_10 = arith.constant 0 : index
    %c0_11 = arith.constant 0 : index
    %16 = vector.load %arg9[%c0_8, %c0_9, %c0_10, %c0_11] : memref<2x10x10x64xf32, #tpu.memory_space<vmem>>, vector<2x1x10x64xf32>
    tpu.vector_store %arg9[%c0_8, %c0_9, %c0_10, %c0_11], %14 {strides = array<i32>} : memref<2x10x10x64xf32, #tpu.memory_space<vmem>>, vector<2x1x10x64xf32>,
    %c0_12 = arith.constant 0 : index
    %c9 = arith.constant 9 : index
    %c0_13 = arith.constant 0 : index
    %c0_14 = arith.constant 0 : index
    %17 = vector.load %arg9[%c0_12, %c9, %c0_13, %c0_14] : memref<2x10x10x64xf32, #tpu.memory_space<vmem>>, vector<2x1x10x64xf32>
    tpu.vector_store %arg9[%c0_12, %c9, %c0_13, %c0_14], %14 {strides = array<i32>} : memref<2x10x10x64xf32, #tpu.memory_space<vmem>>, vector<2x1x10x64xf32>,
    %c0_15 = arith.constant 0 : index
    %c0_16 = arith.constant 0 : index
    %c0_17 = arith.constant 0 : index
    %c0_18 = arith.constant 0 : index
    %18 = vector.load %arg9[%c0_15, %c0_16, %c0_17, %c0_18] : memref<2x10x10x64xf32, #tpu.memory_space<vmem>>, vector<2x10x1x64xf32>
    tpu.vector_store %arg9[%c0_15, %c0_16, %c0_17, %c0_18], %15 {strides = array<i32>} : memref<2x10x10x64xf32, #tpu.memory_space<vmem>>, vector<2x10x1x64xf32>,
    %c0_19 = arith.constant 0 : index
    %c0_20 = arith.constant 0 : index
    %c9_21 = arith.constant 9 : index
    %c0_22 = arith.constant 0 : index
    %19 = vector.load %arg9[%c0_19, %c0_20, %c9_21, %c0_22] : memref<2x10x10x64xf32, #tpu.memory_space<vmem>>, vector<2x10x1x64xf32>
    tpu.vector_store %arg9[%c0_19, %c0_20, %c9_21, %c0_22], %15 {strides = array<i32>} : memref<2x10x10x64xf32, #tpu.memory_space<vmem>>, vector<2x10x1x64xf32>,
    %20 = vector.shape_cast %13 : vector<128x64xf32> to vector<2x8x8x64xf32>
    %c0_23 = arith.constant 0 : index
    %c1 = arith.constant 1 : index
    %c1_24 = arith.constant 1 : index
    %c0_25 = arith.constant 0 : index
    %21 = vector.load %arg9[%c0_23, %c1, %c1_24, %c0_25] : memref<2x10x10x64xf32, #tpu.memory_space<vmem>>, vector<2x8x8x64xf32>
    tpu.vector_store %arg9[%c0_23, %c1, %c1_24, %c0_25], %20 {strides = array<i32>} : memref<2x10x10x64xf32, #tpu.memory_space<vmem>>, vector<2x8x8x64xf32>,
    %c0_26 = arith.constant 0 : index
    %c0_27 = arith.constant 0 : index
    %c0_28 = arith.constant 0 : index
    %c0_29 = arith.constant 0 : index
    %22 = vector.load %arg9[%c0_26, %c0_27, %c0_28, %c0_29] : memref<2x10x10x64xf32, #tpu.memory_space<vmem>>, vector<2x8x8x64xf32>
    %23 = vector.shape_cast %22 : vector<2x8x8x64xf32> to vector<128x64xf32>
    %24 = arith.truncf %23 : vector<128x64xf32> to vector<128x64xbf16>
    %c0_30 = arith.constant 0 : index
    %c0_31 = arith.constant 0 : index
    %c0_32 = arith.constant 0 : index
    %25 = vector.load %arg4[%c0_30, %c0_31, %c0_32] : memref<9x64x128xbf16, #tpu.memory_space<vmem>>, vector<1x64x128xbf16>
    %26 = vector.shape_cast %25 : vector<1x64x128xbf16> to vector<64x128xbf16>
    %cst_33 = arith.constant dense<0.000000e+00> : vector<128x128xf32>
    %27 = tpu.matmul %24, %26, %cst_33 {dimension_numbers = #tpu.dot_dimension_numbers<[1], [0], [0], [1], [0, 0, 1, 1], [], []>} : vector<128x64xbf16>, vector<64x128xbf16>, vector<128x128xf32> -> vector<128x128xf32>
    %c0_34 = arith.constant 0 : index
    %c0_35 = arith.constant 0 : index
    %c1_36 = arith.constant 1 : index
    %c0_37 = arith.constant 0 : index
    %28 = vector.load %arg9[%c0_34, %c0_35, %c1_36, %c0_37] : memref<2x10x10x64xf32, #tpu.memory_space<vmem>>, vector<2x8x8x64xf32>
    %29 = vector.shape_cast %28 : vector<2x8x8x64xf32> to vector<128x64xf32>
    %30 = arith.truncf %29 : vector<128x64xf32> to vector<128x64xbf16>
    %c1_38 = arith.constant 1 : index
    %c0_39 = arith.constant 0 : index
    %c0_40 = arith.constant 0 : index
    %31 = vector.load %arg4[%c1_38, %c0_39, %c0_40] : memref<9x64x128xbf16, #tpu.memory_space<vmem>>, vector<1x64x128xbf16>
    %32 = vector.shape_cast %31 : vector<1x64x128xbf16> to vector<64x128xbf16>
    %cst_41 = arith.constant dense<0.000000e+00> : vector<128x128xf32>
    %33 = tpu.matmul %30, %32, %cst_41 {dimension_numbers = #tpu.dot_dimension_numbers<[1], [0], [0], [1], [0, 0, 1, 1], [], []>} : vector<128x64xbf16>, vector<64x128xbf16>, vector<128x128xf32> -> vector<128x128xf32>
    %34 = arith.addf %27, %33 : vector<128x128xf32>
    %c0_42 = arith.constant 0 : index
    %c0_43 = arith.constant 0 : index
    %c2 = arith.constant 2 : index
    %c0_44 = arith.constant 0 : index
    %35 = vector.load %arg9[%c0_42, %c0_43, %c2, %c0_44] : memref<2x10x10x64xf32, #tpu.memory_space<vmem>>, vector<2x8x8x64xf32>
    %36 = vector.shape_cast %35 : vector<2x8x8x64xf32> to vector<128x64xf32>
    %37 = arith.truncf %36 : vector<128x64xf32> to vector<128x64xbf16>
    %c2_45 = arith.constant 2 : index
    %c0_46 = arith.constant 0 : index
    %c0_47 = arith.constant 0 : index
    %38 = vector.load %arg4[%c2_45, %c0_46, %c0_47] : memref<9x64x128xbf16, #tpu.memory_space<vmem>>, vector<1x64x128xbf16>
    %39 = vector.shape_cast %38 : vector<1x64x128xbf16> to vector<64x128xbf16>
    %cst_48 = arith.constant dense<0.000000e+00> : vector<128x128xf32>
    %40 = tpu.matmul %37, %39, %cst_48 {dimension_numbers = #tpu.dot_dimension_numbers<[1], [0], [0], [1], [0, 0, 1, 1], [], []>} : vector<128x64xbf16>, vector<64x128xbf16>, vector<128x128xf32> -> vector<128x128xf32>
    %41 = arith.addf %34, %40 : vector<128x128xf32>
    %c0_49 = arith.constant 0 : index
    %c1_50 = arith.constant 1 : index
    %c0_51 = arith.constant 0 : index
    %c0_52 = arith.constant 0 : index
    %42 = vector.load %arg9[%c0_49, %c1_50, %c0_51, %c0_52] : memref<2x10x10x64xf32, #tpu.memory_space<vmem>>, vector<2x8x8x64xf32>
    %43 = vector.shape_cast %42 : vector<2x8x8x64xf32> to vector<128x64xf32>
    %44 = arith.truncf %43 : vector<128x64xf32> to vector<128x64xbf16>
    %c3 = arith.constant 3 : index
    %c0_53 = arith.constant 0 : index
    %c0_54 = arith.constant 0 : index
    %45 = vector.load %arg4[%c3, %c0_53, %c0_54] : memref<9x64x128xbf16, #tpu.memory_space<vmem>>, vector<1x64x128xbf16>
    %46 = vector.shape_cast %45 : vector<1x64x128xbf16> to vector<64x128xbf16>
    %cst_55 = arith.constant dense<0.000000e+00> : vector<128x128xf32>
    %47 = tpu.matmul %44, %46, %cst_55 {dimension_numbers = #tpu.dot_dimension_numbers<[1], [0], [0], [1], [0, 0, 1, 1], [], []>} : vector<128x64xbf16>, vector<64x128xbf16>, vector<128x128xf32> -> vector<128x128xf32>
    %48 = arith.addf %41, %47 : vector<128x128xf32>
    %c0_56 = arith.constant 0 : index
    %c1_57 = arith.constant 1 : index
    %c1_58 = arith.constant 1 : index
    %c0_59 = arith.constant 0 : index
    %49 = vector.load %arg9[%c0_56, %c1_57, %c1_58, %c0_59] : memref<2x10x10x64xf32, #tpu.memory_space<vmem>>, vector<2x8x8x64xf32>
    %50 = vector.shape_cast %49 : vector<2x8x8x64xf32> to vector<128x64xf32>
    %51 = arith.truncf %50 : vector<128x64xf32> to vector<128x64xbf16>
    %c4 = arith.constant 4 : index
    %c0_60 = arith.constant 0 : index
    %c0_61 = arith.constant 0 : index
    %52 = vector.load %arg4[%c4, %c0_60, %c0_61] : memref<9x64x128xbf16, #tpu.memory_space<vmem>>, vector<1x64x128xbf16>
    %53 = vector.shape_cast %52 : vector<1x64x128xbf16> to vector<64x128xbf16>
    %cst_62 = arith.constant dense<0.000000e+00> : vector<128x128xf32>
    %54 = tpu.matmul %51, %53, %cst_62 {dimension_numbers = #tpu.dot_dimension_numbers<[1], [0], [0], [1], [0, 0, 1, 1], [], []>} : vector<128x64xbf16>, vector<64x128xbf16>, vector<128x128xf32> -> vector<128x128xf32>
    %55 = arith.addf %48, %54 : vector<128x128xf32>
    %c0_63 = arith.constant 0 : index
    %c1_64 = arith.constant 1 : index
    %c2_65 = arith.constant 2 : index
    %c0_66 = arith.constant 0 : index
    %56 = vector.load %arg9[%c0_63, %c1_64, %c2_65, %c0_66] : memref<2x10x10x64xf32, #tpu.memory_space<vmem>>, vector<2x8x8x64xf32>
    %57 = vector.shape_cast %56 : vector<2x8x8x64xf32> to vector<128x64xf32>
    %58 = arith.truncf %57 : vector<128x64xf32> to vector<128x64xbf16>
    %c5 = arith.constant 5 : index
    %c0_67 = arith.constant 0 : index
    %c0_68 = arith.constant 0 : index
    %59 = vector.load %arg4[%c5, %c0_67, %c0_68] : memref<9x64x128xbf16, #tpu.memory_space<vmem>>, vector<1x64x128xbf16>
    %60 = vector.shape_cast %59 : vector<1x64x128xbf16> to vector<64x128xbf16>
    %cst_69 = arith.constant dense<0.000000e+00> : vector<128x128xf32>
    %61 = tpu.matmul %58, %60, %cst_69 {dimension_numbers = #tpu.dot_dimension_numbers<[1], [0], [0], [1], [0, 0, 1, 1], [], []>} : vector<128x64xbf16>, vector<64x128xbf16>, vector<128x128xf32> -> vector<128x128xf32>
    %62 = arith.addf %55, %61 : vector<128x128xf32>
    %c0_70 = arith.constant 0 : index
    %c2_71 = arith.constant 2 : index
    %c0_72 = arith.constant 0 : index
    %c0_73 = arith.constant 0 : index
    %63 = vector.load %arg9[%c0_70, %c2_71, %c0_72, %c0_73] : memref<2x10x10x64xf32, #tpu.memory_space<vmem>>, vector<2x8x8x64xf32>
    %64 = vector.shape_cast %63 : vector<2x8x8x64xf32> to vector<128x64xf32>
    %65 = arith.truncf %64 : vector<128x64xf32> to vector<128x64xbf16>
    %c6 = arith.constant 6 : index
    %c0_74 = arith.constant 0 : index
    %c0_75 = arith.constant 0 : index
    %66 = vector.load %arg4[%c6, %c0_74, %c0_75] : memref<9x64x128xbf16, #tpu.memory_space<vmem>>, vector<1x64x128xbf16>
    %67 = vector.shape_cast %66 : vector<1x64x128xbf16> to vector<64x128xbf16>
    %cst_76 = arith.constant dense<0.000000e+00> : vector<128x128xf32>
    %68 = tpu.matmul %65, %67, %cst_76 {dimension_numbers = #tpu.dot_dimension_numbers<[1], [0], [0], [1], [0, 0, 1, 1], [], []>} : vector<128x64xbf16>, vector<64x128xbf16>, vector<128x128xf32> -> vector<128x128xf32>
    %69 = arith.addf %62, %68 : vector<128x128xf32>
    %c0_77 = arith.constant 0 : index
    %c2_78 = arith.constant 2 : index
    %c1_79 = arith.constant 1 : index
    %c0_80 = arith.constant 0 : index
    %70 = vector.load %arg9[%c0_77, %c2_78, %c1_79, %c0_80] : memref<2x10x10x64xf32, #tpu.memory_space<vmem>>, vector<2x8x8x64xf32>
    %71 = vector.shape_cast %70 : vector<2x8x8x64xf32> to vector<128x64xf32>
    %72 = arith.truncf %71 : vector<128x64xf32> to vector<128x64xbf16>
    %c7 = arith.constant 7 : index
    %c0_81 = arith.constant 0 : index
    %c0_82 = arith.constant 0 : index
    %73 = vector.load %arg4[%c7, %c0_81, %c0_82] : memref<9x64x128xbf16, #tpu.memory_space<vmem>>, vector<1x64x128xbf16>
    %74 = vector.shape_cast %73 : vector<1x64x128xbf16> to vector<64x128xbf16>
    %cst_83 = arith.constant dense<0.000000e+00> : vector<128x128xf32>
    %75 = tpu.matmul %72, %74, %cst_83 {dimension_numbers = #tpu.dot_dimension_numbers<[1], [0], [0], [1], [0, 0, 1, 1], [], []>} : vector<128x64xbf16>, vector<64x128xbf16>, vector<128x128xf32> -> vector<128x128xf32>
    %76 = arith.addf %69, %75 : vector<128x128xf32>
    %c0_84 = arith.constant 0 : index
    %c2_85 = arith.constant 2 : index
    %c2_86 = arith.constant 2 : index
    %c0_87 = arith.constant 0 : index
    %77 = vector.load %arg9[%c0_84, %c2_85, %c2_86, %c0_87] : memref<2x10x10x64xf32, #tpu.memory_space<vmem>>, vector<2x8x8x64xf32>
    %78 = vector.shape_cast %77 : vector<2x8x8x64xf32> to vector<128x64xf32>
    %79 = arith.truncf %78 : vector<128x64xf32> to vector<128x64xbf16>
    %c8 = arith.constant 8 : index
    %c0_88 = arith.constant 0 : index
    %c0_89 = arith.constant 0 : index
    %80 = vector.load %arg4[%c8, %c0_88, %c0_89] : memref<9x64x128xbf16, #tpu.memory_space<vmem>>, vector<1x64x128xbf16>
    %81 = vector.shape_cast %80 : vector<1x64x128xbf16> to vector<64x128xbf16>
    %cst_90 = arith.constant dense<0.000000e+00> : vector<128x128xf32>
    %82 = tpu.matmul %79, %81, %cst_90 {dimension_numbers = #tpu.dot_dimension_numbers<[1], [0], [0], [1], [0, 0, 1, 1], [], []>} : vector<128x64xbf16>, vector<64x128xbf16>, vector<128x128xf32> -> vector<128x128xf32>
    %83 = arith.addf %76, %82 : vector<128x128xf32>
    %c0_91 = arith.constant 0 : index
    %c0_92 = arith.constant 0 : index
    %84 = vector.load %arg5[%c0_91, %c0_92] : memref<1x128xf32, #tpu.memory_space<vmem>>, vector<1x128xf32>
    %85 = vector.broadcast %84 : vector<1x128xf32> to vector<128x128xf32>
    %86 = arith.addf %83, %85 : vector<128x128xf32>
    %cst_93 = arith.constant 0.000000e+00 : f32
    %87 = vector.broadcast %cst_93 : f32 to vector<128x128xf32>
    %88 = arith.maximumf %86, %87 : vector<128x128xf32>
    %89 = arith.truncf %88 : vector<128x128xf32> to vector<128x128xbf16>
    %c0_94 = arith.constant 0 : index
    %c0_95 = arith.constant 0 : index
    %90 = vector.load %arg6[%c0_94, %c0_95] : memref<128x256xbf16, #tpu.memory_space<vmem>>, vector<128x256xbf16>
    %cst_96 = arith.constant dense<0.000000e+00> : vector<128x256xf32>
    %91 = tpu.matmul %89, %90, %cst_96 {dimension_numbers = #tpu.dot_dimension_numbers<[1], [0], [0], [1], [0, 0, 1, 1], [], []>} : vector<128x128xbf16>, vector<128x256xbf16>, vector<128x256xf32> -> vector<128x256xf32>
    %c0_97 = arith.constant 0 : index
    %c0_98 = arith.constant 0 : index
    %92 = vector.load %arg7[%c0_97, %c0_98] : memref<1x256xf32, #tpu.memory_space<vmem>>, vector<1x256xf32>
    %93 = vector.broadcast %92 : vector<1x256xf32> to vector<128x256xf32>
    %94 = arith.addf %91, %93 : vector<128x256xf32>
    %cst_99 = arith.constant 0.000000e+00 : f32
    %95 = vector.broadcast %cst_99 : f32 to vector<128x256xf32>
    %96 = arith.maximumf %94, %95 : vector<128x256xf32>
    %c0_100 = arith.constant 0 : index
    %c0_101 = arith.constant 0 : index
    %97 = vector.load %arg8[%c0_100, %c0_101] : memref<128x256xf32, #tpu.memory_space<vmem>>, vector<128x256xf32>
    tpu.vector_store %arg8[%c0_100, %c0_101], %96 {strides = array<i32>} : memref<128x256xf32, #tpu.memory_space<vmem>>, vector<128x256xf32>,
    return
  }
  func.func @transform_0(%arg0: i32) -> (i32, i32) {
    %c0_i32 = arith.constant 0 : i32
    %c0_i32_0 = arith.constant 0 : i32
    return %arg0, %c0_i32 : i32, i32
  }
  func.func @transform_1(%arg0: i32) -> (i32, i32) {
    %c0_i32 = arith.constant 0 : i32
    %c0_i32_0 = arith.constant 0 : i32
    %c0_i32_1 = arith.constant 0 : i32
    return %c0_i32, %c0_i32_0 : i32, i32
  }
  func.func @transform_2(%arg0: i32) -> (i32, i32) {
    %c0_i32 = arith.constant 0 : i32
    %c0_i32_0 = arith.constant 0 : i32
    %c0_i32_1 = arith.constant 0 : i32
    return %c0_i32, %c0_i32_0 : i32, i32
  }
  func.func @transform_3(%arg0: i32) -> (i32, i32, i32) {
    %c0_i32 = arith.constant 0 : i32
    %c0_i32_0 = arith.constant 0 : i32
    %c0_i32_1 = arith.constant 0 : i32
    %c0_i32_2 = arith.constant 0 : i32
    return %c0_i32, %c0_i32_0, %c0_i32_1 : i32, i32, i32
  }
  func.func @transform_4(%arg0: i32) -> (i32, i32) {
    %c0_i32 = arith.constant 0 : i32
    %c0_i32_0 = arith.constant 0 : i32
    %c0_i32_1 = arith.constant 0 : i32
    return %c0_i32, %c0_i32_0 : i32, i32
  }
  func.func @transform_5(%arg0: i32) -> (i32, i32) {
    %c0_i32 = arith.constant 0 : i32
    %c0_i32_0 = arith.constant 0 : i32
    %c0_i32_1 = arith.constant 0 : i32
    return %c0_i32, %c0_i32_0 : i32, i32
  }
  func.func @transform_6(%arg0: i32) -> (i32, i32) {
    %c0_i32 = arith.constant 0 : i32
    %c0_i32_0 = arith.constant 0 : i32
    %c0_i32_1 = arith.constant 0 : i32
    return %c0_i32, %c0_i32_0 : i32, i32
  }
  func.func @transform_7(%arg0: i32) -> (i32, i32) {
    %c0_i32 = arith.constant 0 : i32
    %c0_i32_0 = arith.constant 0 : i32
    return %arg0, %c0_i32 : i32, i32
  }
}

</mosaic_0001>

<bundles_post_ra>
// kernel: simple_unet_forward.1
= control target key start
LH: loop header
LB: loop body
LE: loop exit
PB: predicated region body
PF: predicated region fallthrough
CT: control target
= control target key end

     0   :  { %v4214_v1 = vmov 0   ;;  %vm131_vm0 = vcmask 392192   ;;  %v51_v16 = vlaneseq  ;;  %vm397_vm1 = vcmask 523264   ;;  %s3141_s11 = smov 64   ;;  %s4204_s1 = inlined_call_operand.vmem [shape: bf16[48,256], index: 1, kind: input, shape index: {}]   ;;  %s4205_s0 = inlined_call_operand.vmem [shape: bf16[128,48], index: 0, kind: input, shape index: {}]   ;;  %s4206_s3 = inlined_call_operand.vmem [shape: bf16[9,64,128], index: 3, kind: input, shape index: {}]   ;;  %s4207_s2 = inlined_call_operand.vmem [shape: f32[1,256], index: 2, kind: input, shape index: {}]   ;;  %s4208_s5 = inlined_call_operand.vmem [shape: bf16[128,256], index: 5, kind: input, shape index: {}]   ;;  %s4209_s4 = inlined_call_operand.vmem [shape: f32[1,128], index: 4, kind: input, shape index: {}]   ;;  %s4210_s6 = inlined_call_operand.vmem [shape: f32[1,256], index: 6, kind: input, shape index: {}]   ;;  %s4211_s7 = inlined_call_operand.vmem [shape: f32[128,256], index: 7, kind: output, shape index: {}]  }
   0x1   :  { %v3062_v0 = vld [vmem:[%s4204_s1 + $0x24] ss:$8 sps:$4 sm:$0xff]   ;;  %188 = vmatprep.mubr.bf16.mxu0 %v4214_v1  ;;  %v3064_v2 = vld [vmem:[%s4204_s1 + $0x20] ss:$8 sps:$4 sm:$0xff]   ;;  %v3065_v3 = vld [vmem:[%s4204_s1 + $0x14] ss:$8 sps:$4 sm:$0xff]  }
   0x2   :  { %166 = vmatprep.subr.bf16.mxu0 %v3062_v0  ;;  %v3067_v4 = vld [vmem:[%s4204_s1 + $0x10] ss:$8 sps:$4 sm:$0xff]   ;;  %v3068_v5 = vld [vmem:[%s4204_s1 + $0x4] ss:$8 sps:$4 sm:$0xff]   ;;  %v3070_v6 = vld [vmem:[%s4204_s1] ss:$8 sps:$4 sm:$0xff]  }
   0x3   :  { %167 = vmatpush1.bf16.msra.mxu0 %v3064_v2  ;;  %v3071_v7 = vld [vmem:[%s4205_s0] sm:$0xff]   ;;  %v3072_v8 = vld [vmem:[%s4205_s0 + $0x8] sm:$0xff]   ;;  %v3073_v9 = vld [vmem:[%s4205_s0 + $0x10] sm:$0xff]   ;;  %v3243_v17 = vshrl.u32 %v51_v16, 7  ;;  %vm399_vm2 = vcmask 517120   ;;  %v3140_v22 = vmov 0.0  }
   0x4   :  { %168 = vmatprep.subr.bf16.mxu0 %v3065_v3  ;;  %v3074_v10 = vld [vmem:[%s4205_s0 + $0x18] sm:$0xff]   ;;  %v3075_v11 = vld [vmem:[%s4205_s0 + $0x20] sm:$0xff]   ;;  %v3076_v12 = vld [vmem:[%s4205_s0 + $0x28] sm:$0xff]   ;;  %398 = vst.msk [vmem:[#allocation2] sm:$0xff] %vm397_vm1, %v3140_v22  ;;  %vm408_vm3 = vcmask 516096  }
   0x5   :  { %v3077_v13 = vld [vmem:[%s4205_s0 + $0x30] sm:$0xff]   ;;  %v3078_v14 = vld [vmem:[%s4205_s0 + $0x38] sm:$0xff]   ;;  %4218 = vst [vmem:[#allocation3_spill] sm:$0xff] %v3243_v17  ;;  %v4213_v18 = vsub.s32 0, %v3243_v17  ;;  %v49_v19 = vld [vmem:[%s4207_s2] sm:$0x3] }
   0x6   :  { %v3079_v15 = vld [vmem:[%s4206_s3 + $0x38] sm:$0xff]   ;;  %v4212_v20 = vsub.s32 1, %v3243_v17  ;;  %400 = vst.msk [vmem:[#allocation2 + $0x8] sm:$0x3] %vm399_vm2, %v3140_v22  ;;  %402 = vst.msk [vmem:[#allocation2 + $0xa8] sm:$0x3] %vm399_vm2, %v3140_v22 }
   0x7   :  { %169 = vmatpush1.bf16.msra.mxu0 %v3067_v4  ;;  %3051 = vmatprep.subr.bf16.mxu1 %v3079_v15  ;;  %v3252_v21 = vrot.slane %v49_v19, %v4213_v18  ;;  %401 = vst.msk [vmem:[#allocation2 + $0xa0] sm:$0xff] %vm397_vm1, %v3140_v22  ;;  %404 = vst.msk [vmem:[#allocation2 + $0x90] sm:$0xff] %vm397_vm1, %v3140_v22  ;;  %v3080_v27 = vld [vmem:[%s4206_s3 + $0x30] sm:$0xff]   ;;  %v3081_v34 = vld [vmem:[%s4206_s3 + $0x28] sm:$0xff]  }
   0x8   :  { %170 = vmatprep.subr.bf16.mxu0 %v3068_v5  ;;  %3055 = vmatpush3.bf16.msra.mxu1 %v3079_v15  ;;  %405 = vst.msk [vmem:[#allocation2 + $0x98] sm:$0x3] %vm399_vm2, %v3140_v22  ;;  %407 = vst.msk [vmem:[#allocation2 + $0x138] sm:$0x3] %vm399_vm2, %v3140_v22  ;;  %v3300_v23 = vrot.slane %v49_v19, %v4212_v20  ;;  %v3082_v42 = vld [vmem:[%s4206_s3 + $0x20] sm:$0xff]  }
   0x9   :  { %406 = vst.msk [vmem:[#allocation2 + $0x130] sm:$0xff] %vm397_vm1, %v3140_v22  ;;  %3052 = vmatprep.subr.bf16.mxu1 %v3080_v27 }
   0xa   :  { %419 = vst.msk [vmem:[#allocation2 + $0xa0] sm:$0x1] %vm408_vm3, %v3140_v22  ;;  %439 = vst.msk [vmem:[#allocation2 + $0xa9] sm:$0x1] %vm408_vm3, %v3140_v22 }
   0xb   :  { %171 = vmatpush1.bf16.msra.mxu0 %v3070_v6  ;;  %409 = vst.msk [vmem:[#allocation2] sm:$0x1] %vm408_vm3, %v3140_v22  ;;  %410 = vst.msk [vmem:[#allocation2 + $0x10] sm:$0x1] %vm408_vm3, %v3140_v22 }
   0xc   :  { %2835 = vmatprep.subr.bf16.mxu0 %v3079_v15  ;;  %411 = vst.msk [vmem:[#allocation2 + $0x20] sm:$0x1] %vm408_vm3, %v3140_v22  ;;  %412 = vst.msk [vmem:[#allocation2 + $0x30] sm:$0x1] %vm408_vm3, %v3140_v22  ;;  %3056 = vmatpush3.bf16.msra.mxu1 %v3080_v27 }
   0xd   :  { %413 = vst.msk [vmem:[#allocation2 + $0x40] sm:$0x1] %vm408_vm3, %v3140_v22  ;;  %414 = vst.msk [vmem:[#allocation2 + $0x50] sm:$0x1] %vm408_vm3, %v3140_v22  ;;  %3053 = vmatprep.subr.bf16.mxu1 %v3081_v34 }
   0xe   :  { %2530 = vmatmul.mubr.msk.bf16.vlgmr.msra.gmra.mxu0 %vm131_vm0, %v3071_v7  ;;  %415 = vst.msk [vmem:[#allocation2 + $0x60] sm:$0x1] %vm408_vm3, %v3140_v22  ;;  %416 = vst.msk [vmem:[#allocation2 + $0x70] sm:$0x1] %vm408_vm3, %v3140_v22 }
   0xf   :  { %198 = vmatprep.mubr.bf16.mxu0 %v4214_v1  ;;  %2836 = vmatpush3.bf16.msra.mxu0 %v3079_v15  ;;  %417 = vst.msk [vmem:[#allocation2 + $0x80] sm:$0x1] %vm408_vm3, %v3140_v22  ;;  %418 = vst.msk [vmem:[#allocation2 + $0x90] sm:$0x1] %vm408_vm3, %v3140_v22 }
  0x10   :  { %420 = vst.msk [vmem:[#allocation2 + $0xb0] sm:$0x1] %vm408_vm3, %v3140_v22  ;;  %421 = vst.msk [vmem:[#allocation2 + $0xc0] sm:$0x1] %vm408_vm3, %v3140_v22  ;;  %2837 = vmatprep.subr.bf16.mxu0 %v3080_v27  ;;  %3057 = vmatpush3.bf16.msra.mxu1 %v3081_v34 }
  0x11   :  { %422 = vst.msk [vmem:[#allocation2 + $0xd0] sm:$0x1] %vm408_vm3, %v3140_v22  ;;  %423 = vst.msk [vmem:[#allocation2 + $0xe0] sm:$0x1] %vm408_vm3, %v3140_v22  ;;  %3054 = vmatprep.subr.bf16.mxu1 %v3082_v42 }
  0x12   :  { %424 = vst.msk [vmem:[#allocation2 + $0xf0] sm:$0x1] %vm408_vm3, %v3140_v22  ;;  %425 = vst.msk [vmem:[#allocation2 + $0x100] sm:$0x1] %vm408_vm3, %v3140_v22 }
  0x13   :  { %426 = vst.msk [vmem:[#allocation2 + $0x110] sm:$0x1] %vm408_vm3, %v3140_v22  ;;  %427 = vst.msk [vmem:[#allocation2 + $0x120] sm:$0x1] %vm408_vm3, %v3140_v22  ;;  %2838 = vmatpush3.bf16.msra.mxu0 %v3080_v27 }
  0x14   :  { %428 = vst.msk [vmem:[#allocation2 + $0x130] sm:$0x1] %vm408_vm3, %v3140_v22  ;;  %429 = vst.msk [vmem:[#allocation2 + $0x9] sm:$0x1] %vm408_vm3, %v3140_v22  ;;  %2839 = vmatprep.subr.bf16.mxu0 %v3081_v34  ;;  %3058 = vmatpush3.bf16.msra.mxu1 %v3082_v42 }
  0x15   :  { %430 = vst.msk [vmem:[#allocation2 + $0x19] sm:$0x1] %vm408_vm3, %v3140_v22  ;;  %431 = vst.msk [vmem:[#allocation2 + $0x29] sm:$0x1] %vm408_vm3, %v3140_v22 }
  0x16   :  { %2531 = vmatmul.mubr.msk.bf16.gmra.mxu0 %vm131_vm0, %v3072_v8  ;;  %432 = vst.msk [vmem:[#allocation2 + $0x39] sm:$0x1] %vm408_vm3, %v3140_v22  ;;  %433 = vst.msk [vmem:[#allocation2 + $0x49] sm:$0x1] %vm408_vm3, %v3140_v22 }
  0x17   :  { %208 = vmatprep.mubr.bf16.mxu0 %v4214_v1  ;;  %434 = vst.msk [vmem:[#allocation2 + $0x59] sm:$0x1] %vm408_vm3, %v3140_v22  ;;  %435 = vst.msk [vmem:[#allocation2 + $0x69] sm:$0x1] %vm408_vm3, %v3140_v22  ;;  %2840 = vmatpush3.bf16.msra.mxu0 %v3081_v34 }
  0x18   :  { %436 = vst.msk [vmem:[#allocation2 + $0x79] sm:$0x1] %vm408_vm3, %v3140_v22  ;;  %437 = vst.msk [vmem:[#allocation2 + $0x89] sm:$0x1] %vm408_vm3, %v3140_v22  ;;  %2841 = vmatprep.subr.bf16.mxu0 %v3082_v42 }
  0x19   :  { %438 = vst.msk [vmem:[#allocation2 + $0x99] sm:$0x1] %vm408_vm3, %v3140_v22  ;;  %440 = vst.msk [vmem:[#allocation2 + $0xb9] sm:$0x1] %vm408_vm3, %v3140_v22 }
  0x1a   :  { %441 = vst.msk [vmem:[#allocation2 + $0xc9] sm:$0x1] %vm408_vm3, %v3140_v22  ;;  %442 = vst.msk [vmem:[#allocation2 + $0xd9] sm:$0x1] %vm408_vm3, %v3140_v22 }
  0x1b   :  { %443 = vst.msk [vmem:[#allocation2 + $0xe9] sm:$0x1] %vm408_vm3, %v3140_v22  ;;  %444 = vst.msk [vmem:[#allocation2 + $0xf9] sm:$0x1] %vm408_vm3, %v3140_v22  ;;  %2842 = vmatpush3.bf16.msra.mxu0 %v3082_v42 }
  0x1c   :  { %445 = vst.msk [vmem:[#allocation2 + $0x109] sm:$0x1] %vm408_vm3, %v3140_v22  ;;  %446 = vst.msk [vmem:[#allocation2 + $0x119] sm:$0x1] %vm408_vm3, %v3140_v22 }
  0x1d   :  { %447 = vst.msk [vmem:[#allocation2 + $0x129] sm:$0x1] %vm408_vm3, %v3140_v22  ;;  %448 = vst.msk [vmem:[#allocation2 + $0x139] sm:$0x1] %vm408_vm3, %v3140_v22 }
  0x1e   :  { %2532 = vmatmul.mubr.msk.bf16.gmra.mxu0 %vm131_vm0, %v3073_v9 }
  0x1f   :  { %218 = vmatprep.mubr.bf16.mxu0 %v4214_v1 }
  0x26   :  { %2533 = vmatmul.mubr.msk.bf16.gmra.mxu0 %vm131_vm0, %v3074_v10 }
  0x27   :  { %228 = vmatprep.mubr.bf16.mxu0 %v4214_v1 }
  0x2e   :  { %2534 = vmatmul.mubr.msk.bf16.gmra.mxu0 %vm131_vm0, %v3075_v11 }
  0x2f   :  { %238 = vmatprep.mubr.bf16.mxu0 %v4214_v1 }
  0x36   :  { %2535 = vmatmul.mubr.msk.bf16.gmra.mxu0 %vm131_vm0, %v3076_v12 }
  0x37   :  { %248 = vmatprep.mubr.bf16.mxu0 %v4214_v1 }
  0x3e   :  { %2536 = vmatmul.mubr.msk.bf16.gmra.mxu0 %vm131_vm0, %v3077_v13 }
  0x3f   :  { %258 = vmatprep.mubr.bf16.mxu0 %v4214_v1 }
  0x46   :  { %2537 = vmatmul.mubr.msk.bf16.gmra.mxu0 %vm131_vm0, %v3078_v14 }
  0xce   :  { %v190_v24 = vpop.f32.mrf.mxu0 }
  0xcf   :  { %v191_v25 = vadd.f32 %v190_v24, %v3252_v21 }
  0xd0   :  { %v192_v26 = vpop.f32.mrf.mxu0 }
  0xd1   :  { %v193_v28 = vadd.f32 %v192_v26, %v3300_v23  ;;  %v269_v30 = vmax.f32 %v191_v25, 0.0 }
  0xd2   :  { %v194_v29 = vpop.f32.mrf.mxu0 }
  0xd3   :  { %v270_v31 = vmax.f32 %v193_v28, 0.0  ;;  %v195_v32 = vadd.f32 %v194_v29, %v3252_v21 }
  0xd4   :  { %v196_v33 = vpop.f32.mrf.mxu0 }
  0xd5   :  { %v197_v35 = vadd.f32 %v196_v33, %v3300_v23  ;;  %v3312_v36 = vmax.f32 %v269_v30, %v270_v31  ;;  %v271_v38 = vmax.f32 %v195_v32, 0.0 }
  0xd6   :  { %v200_v37 = vpop.f32.mrf.mxu0 }
  0xd7   :  { %v272_v39 = vmax.f32 %v197_v35, 0.0  ;;  %v201_v40 = vadd.f32 %v200_v37, %v3252_v21  ;;  %333 = vrot.lane.b32.xlu1 %v3312_v36, %s3141_s11 }
  0xd8   :  { %v202_v41 = vpop.f32.mrf.mxu0 }
  0xd9   :  { %v203_v43 = vadd.f32 %v202_v41, %v3300_v23  ;;  %v3321_v44 = vmax.f32 %v271_v38, %v272_v39  ;;  %v273_v46 = vmax.f32 %v201_v40, 0.0 }
  0xda   :  { %v204_v45 = vpop.f32.mrf.mxu0 }
  0xdb   :  { %v274_v47 = vmax.f32 %v203_v43, 0.0  ;;  %v205_v48 = vadd.f32 %v204_v45, %v3252_v21  ;;  %335 = vrot.lane.b32.xlu0 %v3321_v44, %s3141_s11 }
  0xdc   :  { %v206_v49 = vpop.f32.mrf.mxu0 }
  0xdd   :  { %v3326_v50 = vmax.f32 %v273_v46, %v274_v47  ;;  %v207_v51 = vadd.f32 %v206_v49, %v3300_v23  ;;  %v275_v53 = vmax.f32 %v205_v48, 0.0 }
  0xde   :  { %v210_v52 = vpop.f32.mrf.mxu0 }
  0xdf   :  { %v276_v54 = vmax.f32 %v207_v51, 0.0  ;;  %v211_v55 = vadd.f32 %v210_v52, %v3252_v21  ;;  %337 = vrot.lane.b32.xlu1 %v3326_v50, %s3141_s11  ;;  %v3376_v51 = vld [vmem:[%s4206_s3 + $0x18] sm:$0xff]  }
  0xe0   :  { %v212_v56 = vpop.f32.mrf.mxu0  ;;  %2859 = vmatprep.subr.bf16.mxu1 %v3376_v51 }
  0xe1   :  { %v3332_v57 = vmax.f32 %v275_v53, %v276_v54  ;;  %v213_v58 = vadd.f32 %v212_v56, %v3300_v23  ;;  %v277_v60 = vmax.f32 %v211_v55, 0.0 }
  0xe2   :  { %v214_v59 = vpop.f32.mrf.mxu0 }
  0xe3   :  { %v278_v61 = vmax.f32 %v213_v58, 0.0  ;;  %339 = vrot.lane.b32.xlu0 %v3332_v57, %s3141_s11  ;;  %v215_v54 = vadd.f32 %v214_v59, %v3252_v21 }
  0xe4   :  { %v216_v62 = vpop.f32.mrf.mxu0 }
  0xe5   :  { %v3337_v63 = vmax.f32 %v277_v60, %v278_v61  ;;  %v217_v48 = vadd.f32 %v216_v62, %v3300_v23 }
  0xe6   :  { %v3339_v0 = vpop.f32.mrf.mxu0 }
  0xe7   :  { %341 = vrot.lane.b32.xlu1 %v3337_v63, %s3141_s11  ;;  %v280_v61 = vmax.f32 %v217_v48, 0.0 }
  0xe8   :  { %v222_v2 = vpop.f32.mrf.mxu0 }
  0xea   :  { %v3343_v3 = vpop.f32.mrf.mxu0 }
  0xec   :  { %v226_v4 = vpop.f32.mrf.mxu0 }
  0xed   :  { %v227_v59 = vadd.f32 %v226_v4, %v3300_v23 }
  0xee   :  { %v230_v5 = vpop.f32.mrf.mxu0 }
  0xef   :  { %v231_v6 = vadd.f32 %v230_v5, %v3252_v21  ;;  %v3084_v5 = vld [vmem:[%s4206_s3 + $0x58] sm:$0xff]  }
  0xf0   :  { %v232_v7 = vpop.f32.mrf.mxu0  ;;  %2883 = vmatprep.subr.bf16.mxu0 %v3084_v5 }
  0xf1   :  { %v233_v8 = vadd.f32 %v232_v7, %v3300_v23  ;;  %v285_v10 = vmax.f32 %v231_v6, 0.0  ;;  %v223_v6 = vadd.f32 %v222_v2, %v3300_v23 }
  0xf2   :  { %v234_v9 = vpop.f32.mrf.mxu0 }
  0xf3   :  { %v286_v11 = vmax.f32 %v233_v8, 0.0  ;;  %v235_v12 = vadd.f32 %v234_v9, %v3252_v21  ;;  %v279_v9 = vmax.f32 %v215_v54, 0.0 }
  0xf4   :  { %v236_v13 = vpop.f32.mrf.mxu0 }
  0xf5   :  { %v3348_v14 = vmax.f32 %v285_v10, %v286_v11  ;;  %v237_v15 = vadd.f32 %v236_v13, %v3300_v23  ;;  %v287_v19 = vmax.f32 %v235_v12, 0.0  ;;  %v221_v10 = vadd.f32 %v3339_v0, %v3252_v21 }
  0xf6   :  { %v240_v16 = vpop.f32.mrf.mxu0  ;;  %v225_v12 = vadd.f32 %v3343_v3, %v3252_v21  ;;  %v3401_v2 = vmax.f32 %v279_v9, %v280_v61 }
  0xf7   :  { %v288_v22 = vmax.f32 %v237_v15, 0.0  ;;  %v241_v24 = vadd.f32 %v240_v16, %v3252_v21  ;;  %349 = vrot.lane.b32.xlu0 %v3348_v14, %s3141_s11 }
  0xf8   :  { %v242_v25 = vpop.f32.mrf.mxu0 }
  0xf9   :  { %v3354_v26 = vmax.f32 %v287_v19, %v288_v22  ;;  %v243_v27 = vadd.f32 %v242_v25, %v3300_v23  ;;  %v289_v29 = vmax.f32 %v241_v24, 0.0  ;;  %v282_v19 = vmax.f32 %v223_v6, 0.0  ;;  %v506_v6 = vld [vmem:[#allocation2 + $0xa1] sm:$0xff] }
  0xfa   :  { %v244_v28 = vpop.f32.mrf.mxu0  ;;  %v284_v22 = vmax.f32 %v227_v59, 0.0  ;;  %v281_v25 = vmax.f32 %v221_v10, 0.0 }
  0xfb   :  { %v290_v30 = vmax.f32 %v243_v27, 0.0  ;;  %v245_v31 = vadd.f32 %v244_v28, %v3252_v21  ;;  %351 = vrot.lane.b32.xlu0 %v3354_v26, %s3141_s11  ;;  %v283_v27 = vmax.f32 %v225_v12, 0.0 }
  0xfc   :  { %v246_v32 = vpop.f32.mrf.mxu0 }
  0xfd   :  { %v3360_v33 = vmax.f32 %v289_v29, %v290_v30  ;;  %v247_v34 = vadd.f32 %v246_v32, %v3300_v23  ;;  %v291_v37 = vmax.f32 %v245_v31, 0.0  ;;  %v3412_v29 = vmax.f32 %v283_v27, %v284_v22 }
  0xfe   :  { %v250_v35 = vpop.f32.mrf.mxu0 }
  0xff   :  { %v292_v38 = vmax.f32 %v247_v34, 0.0  ;;  %v251_v39 = vadd.f32 %v250_v35, %v3252_v21  ;;  %353 = vrot.lane.b32.xlu1 %v3360_v33, %s3141_s11 }
 0x100   :  { %v252_v40 = vpop.f32.mrf.mxu0 }
 0x101   :  { %v3366_v41 = vmax.f32 %v291_v37, %v292_v38  ;;  %v253_v42 = vadd.f32 %v252_v40, %v3300_v23  ;;  %v293_v45 = vmax.f32 %v251_v39, 0.0  ;;  %v498_v37 = vld [vmem:[#allocation2 + $0x1] sm:$0xff] }
 0x102   :  { %v254_v43 = vpop.f32.mrf.mxu0 }
 0x103   :  { %v294_v46 = vmax.f32 %v253_v42, 0.0  ;;  %v255_v47 = vadd.f32 %v254_v43, %v3252_v21  ;;  %355 = vrot.lane.b32.xlu0 %v3366_v41, %s3141_s11 }
 0x104   :  { %v256_v49 = vpop.f32.mrf.mxu0 }
 0x105   :  { %v3378_v52 = vmax.f32 %v293_v45, %v294_v46  ;;  %v257_v53 = vadd.f32 %v256_v49, %v3300_v23  ;;  %v295_v56 = vmax.f32 %v255_v47, 0.0 }
 0x106   :  { %v260_v55 = vpop.f32.mrf.mxu0 }
 0x107   :  { %v296_v58 = vmax.f32 %v257_v53, 0.0  ;;  %v261_v60 = vadd.f32 %v260_v55, %v3252_v21  ;;  %357 = vrot.lane.b32.xlu1 %v3378_v52, %s3141_s11  ;;  %v3090_v55 = vld [vmem:[%s4206_s3 + $0x40] sm:$0xff]  }
 0x108   :  { %v262_v62 = vpop.f32.mrf.mxu0 }
 0x109   :  { %v3391_v7 = vmax.f32 %v295_v56, %v296_v58  ;;  %v263_v8 = vadd.f32 %v262_v62, %v3300_v23  ;;  %v297_v13 = vmax.f32 %v261_v60, 0.0  ;;  %v3472_v56 = vld [vmem:[%s4206_s3 + $0x98] sm:$0xff]  }
 0x10a   :  { %v264_v11 = vpop.f32.mrf.mxu0 }
 0x10b   :  { %v298_v15 = vmax.f32 %v263_v8, 0.0  ;;  %v265_v16 = vadd.f32 %v264_v11, %v3252_v21  ;;  %359 = vrot.lane.b32.xlu0 %v3391_v7, %s3141_s11  ;;  %v3410_v21 = vmax.f32 %v281_v25, %v282_v19 }
 0x10c   :  { %v266_v4 = vpop.f32.mrf.mxu0 }
 0x10d   :  { %v3403_v24 = vmax.f32 %v297_v13, %v298_v15  ;;  %v267_v0 = vadd.f32 %v266_v4, %v3300_v23  ;;  %v299_v28 = vmax.f32 %v265_v16, 0.0 }
 0x10f   :  { %v300_v3 = vmax.f32 %v267_v0, 0.0  ;;  %343 = vrot.lane.b32.xlu0 %v3401_v2, %s3141_s11  ;;  %361 = vrot.lane.b32.xlu1 %v3403_v24, %s3141_s11 }
 0x111   :  { %v3414_v30 = vmax.f32 %v299_v28, %v300_v3  ;;  %v3089_v3 = vld [vmem:[%s4206_s3] sm:$0xff]  }
 0x113   :  { %347 = vrot.lane.b32.xlu0 %v3412_v29, %s3141_s11  ;;  %345 = vrot.lane.b32.xlu1 %v3410_v21, %s3141_s11 }
 0x117   :  { %363 = vrot.lane.b32.xlu1 %v3414_v30, %s3141_s11 }
 0x149   :  { %v334_v23 = vpop.permute.xlu1 %333 }
 0x14a   :  { %v381_v31 = vmax.f32 %v3312_v36, %v334_v23 }
 0x14c   :  { %450 = vst.msk [vmem:[#allocation2 + $0x11] sm:$0xff] %vm397_vm1, %v381_v31 }
 0x14d   :  { %v336_v32 = vpop.permute.xlu0 %335 }
 0x14e   :  { %v382_v34 = vmax.f32 %v3321_v44, %v336_v32  ;;  %v3091_v32 = vld [vmem:[%s4206_s3 + $0x78] sm:$0xff]  }
 0x150   :  { %451 = vst.msk [vmem:[#allocation2 + $0x21] sm:$0xff] %vm397_vm1, %v382_v34 }
 0x151   :  { %v338_v35 = vpop.permute.xlu1 %337 }
 0x152   :  { %v383_v38 = vmax.f32 %v3326_v50, %v338_v35 }
 0x153   :  { %v3427_v39 = vld [vmem:[#allocation2 + $0x11] sm:$0xff] }
 0x154   :  { %452 = vst.msk [vmem:[#allocation2 + $0x31] sm:$0xff] %vm397_vm1, %v383_v38  ;;  %v514_v40 = vpack.c.bf16 %v3427_v39, %v498_v37  ;;  %v466_v37 = vld [vmem:[#allocation2] sm:$0xff] }
 0x155   :  { %v340_v42 = vpop.permute.xlu0 %339 }
 0x156   :  { %v384_v36 = vmax.f32 %v3332_v57, %v340_v42  ;;  %2843 = vmatprep.mubr.msk.bf16.mxu0 %vm397_vm1, %v514_v40  ;;  %v3086_v57 = vld [vmem:[%s4206_s3 + $0x50] sm:$0xff]  }
 0x157   :  { %v3433_v43 = vld [vmem:[#allocation2 + $0x21] sm:$0xff] }
 0x158   :  { %453 = vst.msk [vmem:[#allocation2 + $0x41] sm:$0xff] %vm397_vm1, %v384_v36  ;;  %v3551_v36 = vld [vmem:[#allocation2 + $0x12] sm:$0xff]  ;;  %v4219_v17 = vpack.c.bf16 %v3433_v43, %v3427_v39 }
 0x159   :  { %v342_v45 = vpop.permute.xlu1 %341 }
 0x15a   :  { %v385_v50 = vmax.f32 %v3337_v63, %v342_v45  ;;  %v3088_v63 = vld [vmem:[%s4206_s3 + $0x48] sm:$0xff]  }
 0x15b   :  { %v3439_v46 = vld [vmem:[#allocation2 + $0x31] sm:$0xff] }
 0x15c   :  { %454 = vst.msk [vmem:[#allocation2 + $0x51] sm:$0xff] %vm397_vm1, %v385_v50  ;;  %v3444_v47 = vpack.c.bf16 %v3439_v46, %v3433_v43 }
 0x15e   :  { %2844 = vmatmul.mubr.msk.bf16.vlgmr.msra.gmra.mxu0 %vm397_vm1, %v3444_v47 }
 0x15f   :  { %v3451_v48 = vld [vmem:[#allocation2 + $0x41] sm:$0xff]  ;;  %2884 = vmatpush3.bf16.msra.mxu0 %v3084_v5 }
 0x160   :  { %2885 = vmatprep.subr.bf16.mxu0 %v3086_v57 }
 0x163   :  { %v3458_v53 = vld [vmem:[#allocation2 + $0x51] sm:$0xff]  ;;  %2886 = vmatpush3.bf16.msra.mxu0 %v3086_v57 }
 0x164   :  { %v3462_v54 = vpack.c.bf16 %v3458_v53, %v3451_v48  ;;  %2887 = vmatprep.subr.bf16.mxu0 %v3088_v63 }
 0x166   :  { %2847 = vmatprep.mubr.msk.bf16.mxu0 %vm397_vm1, %v3462_v54 }
 0x167   :  { %2888 = vmatpush3.bf16.msra.mxu0 %v3088_v63 }
 0x168   :  { %2889 = vmatprep.subr.bf16.mxu0 %v3090_v55 }
 0x169   :  { %v350_v58 = vpop.permute.xlu0 %349 }
 0x16a   :  { %v389_v60 = vmax.f32 %v3348_v14, %v350_v58  ;;  %v3567_v58 = vld [vmem:[#allocation2 + $0x50] sm:$0xff] }
 0x16b   :  { %2890 = vmatpush3.bf16.msra.mxu0 %v3090_v55  ;;  %v3563_v55 = vld [vmem:[#allocation2 + $0x30] sm:$0xff] }
 0x16c   :  { %458 = vst.msk [vmem:[#allocation2 + $0xb1] sm:$0xff] %vm397_vm1, %v389_v60  ;;  %2931 = vmatprep.subr.bf16.mxu0 %v3472_v56  ;;  %v3570_v60 = vld [vmem:[#allocation2 + $0x20] sm:$0xff] }
 0x16d   :  { %v352_v61 = vpop.permute.xlu0 %351 }
 0x16e   :  { %v390_v62 = vmax.f32 %v3354_v26, %v352_v61  ;;  %v3574_v61 = vpack.c.bf16 %v3563_v55, %v3570_v60 }
 0x170   :  { %459 = vst.msk [vmem:[#allocation2 + $0xc1] sm:$0xff] %vm397_vm1, %v390_v62  ;;  %v3576_v62 = vld [vmem:[#allocation2 + $0x40] sm:$0xff] }
 0x171   :  { %v354_v5 = vpop.permute.xlu1 %353 }
 0x172   :  { %v391_v59 = vmax.f32 %v3360_v33, %v354_v5  ;;  %v3093_v5 = vld [vmem:[%s4206_s3 + $0x70] sm:$0xff]  }
 0x173   :  { %v3480_v8 = vld [vmem:[#allocation2 + $0xb1] sm:$0xff] }
 0x174   :  { %460 = vst.msk [vmem:[#allocation2 + $0xd1] sm:$0xff] %vm397_vm1, %v391_v59  ;;  %v518_v14 = vpack.c.bf16 %v3480_v8, %v506_v6  ;;  %v3583_v6 = vpack.c.bf16 %v3567_v58, %v3576_v62  ;;  %v3585_v59 = vld [vmem:[#allocation2 + $0x32] sm:$0xff] }
 0x175   :  { %v356_v9 = vpop.permute.xlu0 %355 }
 0x176   :  { %v392_v10 = vmax.f32 %v3366_v41, %v356_v9  ;;  %2851 = vmatprep.mubr.msk.bf16.mxu1 %vm397_vm1, %v518_v14  ;;  %v3085_v41 = vld [vmem:[%s4206_s3 + $0x10] sm:$0xff]   ;;  %v3593_v9 = vld [vmem:[#allocation2 + $0x22] sm:$0xff] }
 0x177   :  { %v3486_v11 = vld [vmem:[#allocation2 + $0xc1] sm:$0xff]  ;;  %v3589_v14 = vld [vmem:[#allocation2 + $0x52] sm:$0xff] }
 0x178   :  { %461 = vst.msk [vmem:[#allocation2 + $0xe1] sm:$0xff] %vm397_vm1, %v392_v10  ;;  %v3597_v10 = vpack.c.bf16 %v3585_v59, %v3593_v9 }
 0x179   :  { %v358_v12 = vpop.permute.xlu1 %357 }
 0x17a   :  { %v393_v33 = vmax.f32 %v3378_v52, %v358_v12  ;;  %v3087_v52 = vld [vmem:[%s4206_s3 + $0x8] sm:$0xff]  }
 0x17b   :  { %v3492_v13 = vld [vmem:[#allocation2 + $0xd1] sm:$0xff]  ;;  %v3599_v12 = vld [vmem:[#allocation2 + $0x42] sm:$0xff] }
 0x17c   :  { %462 = vst.msk [vmem:[#allocation2 + $0xf1] sm:$0xff] %vm397_vm1, %v393_v33  ;;  %v3497_v15 = vpack.c.bf16 %v3492_v13, %v3486_v11  ;;  %v3094_v33 = vld [vmem:[%s4206_s3 + $0x90] sm:$0xff]  }
 0x17d   :  { %v360_v16 = vpop.permute.xlu0 %359 }
 0x17e   :  { %v394_v4 = vmax.f32 %v3391_v7, %v360_v16  ;;  %2852 = vmatmul.mubr.msk.bf16.vlgmr.msra.gmra.mxu1 %vm397_vm1, %v3497_v15 }
 0x17f   :  { %v3505_v19 = vld [vmem:[#allocation2 + $0xe1] sm:$0xff]  ;;  %2860 = vmatpush3.bf16.msra.mxu1 %v3376_v51 }
 0x180   :  { %463 = vst.msk [vmem:[#allocation2 + $0x101] sm:$0xff] %vm397_vm1, %v394_v4  ;;  %2861 = vmatprep.subr.bf16.mxu1 %v3085_v41  ;;  %v3095_v4 = vld [vmem:[%s4206_s3 + $0x68] sm:$0xff]  }
 0x181   :  { %v344_v0 = vpop.permute.xlu0 %343  ;;  %v362_v25 = vpop.permute.xlu1 %361 }
 0x182   :  { %v386_v7 = vmax.f32 %v3401_v2, %v344_v0  ;;  %v395_v27 = vmax.f32 %v3403_v24, %v362_v25  ;;  %v3615_v0 = vld [vmem:[#allocation2 + $0xb0] sm:$0xff] }
 0x183   :  { %v3516_v28 = vld [vmem:[#allocation2 + $0xf1] sm:$0xff]  ;;  %2862 = vmatpush3.bf16.msra.mxu1 %v3085_v41  ;;  %v3606_v41 = vpack.c.bf16 %v3589_v14, %v3599_v12 }
 0x184   :  { %455 = vst.msk [vmem:[#allocation2 + $0x61] sm:$0xff] %vm397_vm1, %v386_v7  ;;  %464 = vst.msk [vmem:[#allocation2 + $0x111] sm:$0xff] %vm397_vm1, %v395_v27  ;;  %v3522_v51 = vpack.c.bf16 %v3516_v28, %v3505_v19  ;;  %2863 = vmatprep.subr.bf16.mxu1 %v3087_v52  ;;  %v3096_v27 = vld [vmem:[%s4206_s3 + $0x88] sm:$0xff]  }
 0x185   :  { %v348_v23 = vpop.permute.xlu0 %347  ;;  %v346_v2 = vpop.permute.xlu1 %345 }
 0x186   :  { %v388_v24 = vmax.f32 %v3412_v29, %v348_v23  ;;  %v387_v31 = vmax.f32 %v3410_v21, %v346_v2  ;;  %2855 = vmatprep.mubr.msk.bf16.mxu1 %vm397_vm1, %v3522_v51  ;;  %v3537_v29 = vld [vmem:[#allocation2 + $0x10] sm:$0xff]  ;;  %v829_v2 = vld [vmem:[#allocation2 + $0xa2] sm:$0xff] }
 0x187   :  { %2864 = vmatpush3.bf16.msra.mxu1 %v3087_v52  ;;  %v3539_v21 = vld [vmem:[#allocation2 + $0x101] sm:$0xff]  ;;  %v482_v42 = vpack.c.bf16 %v3537_v29, %v466_v37  ;;  %v3650_v37 = vld [vmem:[#allocation2 + $0xd0] sm:$0xff]  ;;  %v1031_v22 = vpack.c.bf16 %v3570_v60, %v3537_v29  ;;  %v1032_v29 = vpack.c.bf16 %v3576_v62, %v3563_v55 }
 0x188   :  { %457 = vst.msk [vmem:[#allocation2 + $0x81] sm:$0xff] %vm397_vm1, %v388_v24  ;;  %456 = vst.msk [vmem:[#allocation2 + $0x71] sm:$0xff] %vm397_vm1, %v387_v31  ;;  %2865 = vmatprep.subr.bf16.mxu1 %v3089_v3  ;;  %v474_v52 = vld [vmem:[#allocation2 + $0xa0] sm:$0xff]  ;;  %v3637_v24 = vld [vmem:[#allocation2 + $0xb2] sm:$0xff] }
 0x189   :  { %v364_v34 = vpop.permute.xlu1 %363  ;;  %v3708_v49 = vld [vmem:[#allocation2 + $0x102] sm:$0xff] }
 0x18a   :  { %v396_v35 = vmax.f32 %v3414_v30, %v364_v34  ;;  %v821_v30 = vld [vmem:[#allocation2 + $0x2] sm:$0xff] }
 0x18b   :  { %v3541_v38 = vld [vmem:[#allocation2 + $0x111] sm:$0xff]  ;;  %2866 = vmatpush3.bf16.msra.mxu1 %v3089_v3  ;;  %v3554_v45 = vld [vmem:[#allocation2 + $0x61] sm:$0xff]  ;;  %v837_v63 = vpack.c.bf16 %v3551_v36, %v821_v30  ;;  %v486_v3 = vpack.c.bf16 %v3615_v0, %v474_v52 }
 0x18c   :  { %465 = vst.msk [vmem:[#allocation2 + $0x121] sm:$0xff] %vm397_vm1, %v396_v35  ;;  %v3546_v40 = vpack.c.bf16 %v3541_v38, %v3539_v21  ;;  %2907 = vmatprep.subr.bf16.mxu1 %v3091_v32  ;;  %v3620_v25 = vld [vmem:[#allocation2 + $0x60] sm:$0xff]  ;;  %v841_v35 = vpack.c.bf16 %v3637_v24, %v829_v2  ;;  %v3657_v30 = vld [vmem:[#allocation2 + $0xf0] sm:$0xff]  ;;  %v1227_v39 = vpack.c.bf16 %v3554_v45, %v3458_v53  ;;  %v3103_v55 = vld [vmem:[%s4206_s3 + $0xa8] sm:$0xff]  }
 0x18d   :  { %v3640_v31 = vld [vmem:[#allocation2 + $0x62] sm:$0xff]  ;;  %v3692_v18 = vld [vmem:[#allocation2 + $0x110] sm:$0xff]  ;;  %v1033_v60 = vpack.c.bf16 %v3620_v25, %v3567_v58  ;;  %v4220_v58 = vpack.c.bf16 %v3451_v48, %v3439_v46 }
 0x18e   :  { %2856 = vmatmul.mubr.msk.bf16.gmra.mxu1 %vm397_vm1, %v3546_v40  ;;  %v3098_v34 = vld [vmem:[%s4206_s3 + $0x80] sm:$0xff]   ;;  %v3703_v26 = vld [vmem:[#allocation2 + $0x112] sm:$0xff]  ;;  %v3104_v53 = vld [vmem:[%s4206_s3 + $0xc8] sm:$0xff]  }
 0x18f   :  { %2867 = vmatprep.mubr.msk.bf16.mxu1 %vm397_vm1, %v482_v42  ;;  %v3556_v50 = vld [vmem:[#allocation2 + $0x71] sm:$0xff]  ;;  %v3712_v44 = vpack.c.bf16 %v3703_v26, %v3708_v49  ;;  %v3734_v43 = vld [vmem:[#allocation2 + $0x80] sm:$0xff] }
 0x190   :  { %v3560_v57 = vpack.c.bf16 %v3556_v50, %v3554_v45  ;;  %v3608_v16 = vld [vmem:[#allocation2 + $0x70] sm:$0xff]  ;;  %v3099_v42 = vld [vmem:[%s4206_s3 + $0xb8] sm:$0xff]   ;;  %v3105_v46 = vld [vmem:[%s4206_s3 + $0xa0] sm:$0xff]  }
 0x191   :  { %v3624_v7 = vpack.c.bf16 %v3608_v16, %v3620_v25  ;;  %v3630_v23 = vld [vmem:[#allocation2 + $0x72] sm:$0xff]  ;;  %v1034_v62 = vpack.c.bf16 %v3734_v43, %v3608_v16  ;;  %v3750_v25 = vld [vmem:[#allocation2 + $0x81] sm:$0xff] }
 0x192   :  { %2848 = vmatmul.mubr.msk.bf16.gmra.mxu0 %vm397_vm1, %v3560_v57  ;;  %v1228_v48 = vpack.c.bf16 %v3750_v25, %v3556_v50  ;;  %v3106_v16 = vld [vmem:[%s4206_s3 + $0xc0] sm:$0xff]  }
 0x193   :  { %2891 = vmatprep.mubr.msk.bf16.mxu0 %vm397_vm1, %v837_v63  ;;  %v476_v63 = vld [vmem:[#allocation2 + $0xc0] sm:$0xff] }
 0x194   :  { %v1035_v45 = vpack.c.bf16 %v476_v63, %v3615_v0  ;;  %v3107_v0 = vld [vmem:[%s4206_s3 + $0xf8] sm:$0xff]  }
 0x196   :  { %2868 = vmatmul.mubr.msk.bf16.vlgmr.msra.gmra.mxu1 %vm397_vm1, %v3574_v61 }
 0x197   :  { %2871 = vmatprep.mubr.msk.bf16.mxu1 %vm397_vm1, %v3583_v6  ;;  %2908 = vmatpush3.bf16.msra.mxu1 %v3091_v32  ;;  %v3644_v32 = vpack.c.bf16 %v3630_v23, %v3640_v31 }
 0x198   :  { %2909 = vmatprep.subr.bf16.mxu1 %v3093_v5 }
 0x19a   :  { %2892 = vmatmul.mubr.msk.bf16.vlgmr.msra.gmra.mxu0 %vm397_vm1, %v3597_v10 }
 0x19b   :  { %2932 = vmatpush3.bf16.msra.mxu0 %v3472_v56  ;;  %2895 = vmatprep.mubr.msk.bf16.mxu0 %vm397_vm1, %v3606_v41  ;;  %v3097_v56 = vld [vmem:[%s4206_s3 + $0x60] sm:$0xff]  }
 0x19c   :  { %2910 = vmatpush3.bf16.msra.mxu1 %v3093_v5  ;;  %2933 = vmatprep.subr.bf16.mxu0 %v3094_v33  ;;  %v3661_v5 = vpack.c.bf16 %v3650_v37, %v476_v63  ;;  %v3108_v63 = vld [vmem:[%s4206_s3 + $0x118] sm:$0xff]  }
 0x19d   :  { %2911 = vmatprep.subr.bf16.mxu1 %v3095_v4 }
 0x19e   :  { %2872 = vmatmul.mubr.msk.bf16.gmra.mxu1 %vm397_vm1, %v3624_v7 }
 0x19f   :  { %2875 = vmatprep.mubr.msk.bf16.mxu1 %vm397_vm1, %v486_v3  ;;  %2934 = vmatpush3.bf16.msra.mxu0 %v3094_v33  ;;  %v3663_v33 = vld [vmem:[#allocation2 + $0xe0] sm:$0xff]  ;;  %v3672_v3 = vld [vmem:[#allocation2 + $0xd2] sm:$0xff] }
 0x1a0   :  { %2912 = vmatpush3.bf16.msra.mxu1 %v3095_v4  ;;  %2935 = vmatprep.subr.bf16.mxu0 %v3096_v27  ;;  %v3100_v4 = vld [vmem:[%s4206_s3 + $0xd8] sm:$0xff]   ;;  %v3670_v52 = vpack.c.bf16 %v3657_v30, %v3663_v33  ;;  %v1036_v50 = vpack.c.bf16 %v3663_v33, %v3650_v37  ;;  %v4222_v37 = vpack.c.bf16 %v3505_v19, %v3492_v13  ;;  %v3109_v13 = vld [vmem:[%s4206_s3 + $0xf0] sm:$0xff]  }
 0x1a1   :  { %2913 = vmatprep.subr.bf16.mxu1 %v3097_v56  ;;  %v1419_v33 = vpack.c.bf16 %v3593_v9, %v3551_v36  ;;  %v1421_v19 = vpack.c.bf16 %v3640_v31, %v3589_v14  ;;  %v3111_v36 = vld [vmem:[%s4206_s3 + $0xe8] sm:$0xff]   ;;  %v1605_v9 = vld [vmem:[#allocation2 + $0x90] sm:$0xff] }
 0x1a2   :  { %2896 = vmatmul.mubr.msk.bf16.gmra.mxu0 %vm397_vm1, %v3644_v32  ;;  %v1418_v31 = vld [vmem:[#allocation2 + $0x122] sm:$0xff] }
 0x1a3   :  { %2899 = vmatprep.mubr.msk.bf16.mxu0 %vm397_vm1, %v841_v35  ;;  %2936 = vmatpush3.bf16.msra.mxu0 %v3096_v27  ;;  %v3676_v27 = vld [vmem:[#allocation2 + $0xf2] sm:$0xff]  ;;  %v3686_v35 = vld [vmem:[#allocation2 + $0xe2] sm:$0xff] }
 0x1a4   :  { %2914 = vmatpush3.bf16.msra.mxu1 %v3097_v56  ;;  %2937 = vmatprep.subr.bf16.mxu0 %v3098_v34  ;;  %v3680_v56 = vld [vmem:[#allocation2 + $0xc2] sm:$0xff]  ;;  %v3690_v20 = vpack.c.bf16 %v3676_v27, %v3686_v35 }
 0x1a5   :  { %2955 = vmatprep.subr.bf16.mxu1 %v3099_v42  ;;  %v3684_v2 = vpack.c.bf16 %v3672_v3, %v3680_v56  ;;  %v1423_v14 = vpack.c.bf16 %v3680_v56, %v3637_v24  ;;  %v1425_v24 = vpack.c.bf16 %v3708_v49, %v3676_v27  ;;  %v3123_v27 = vld [vmem:[%s4208_s5 + $0x54] ss:$8 sps:$4 sm:$0xff]   ;;  %v3124_v56 = vld [vmem:[%s4208_s5 + $0x40] ss:$8 sps:$4 sm:$0xff]  }
 0x1a6   :  { %2876 = vmatmul.mubr.msk.bf16.gmra.mxu1 %vm397_vm1, %v3661_v5 }
 0x1a7   :  { %2879 = vmatprep.mubr.msk.bf16.mxu1 %vm397_vm1, %v3670_v52  ;;  %2938 = vmatpush3.bf16.msra.mxu0 %v3098_v34  ;;  %v480_v34 = vld [vmem:[#allocation2 + $0x100] sm:$0xff] }
 0x1a8   :  { %2979 = vmatprep.subr.bf16.mxu0 %v3100_v4  ;;  %v3699_v1 = vpack.c.bf16 %v3692_v18, %v480_v34 }
 0x1aa   :  { %2900 = vmatmul.mubr.msk.bf16.gmra.mxu0 %vm397_vm1, %v3684_v2 }
 0x1ab   :  { %2903 = vmatprep.mubr.msk.bf16.mxu0 %vm397_vm1, %v3690_v20 }
 0x1ae   :  { %2880 = vmatmul.mubr.msk.bf16.gmra.mxu1 %vm397_vm1, %v3699_v1 }
 0x1af   :  { %2915 = vmatprep.mubr.msk.bf16.mxu1 %vm397_vm1, %v1031_v22  ;;  %v3101_v22 = vld [vmem:[%s4206_s3 + $0xb0] sm:$0xff]  }
 0x1b2   :  { %2904 = vmatmul.mubr.msk.bf16.gmra.mxu0 %vm397_vm1, %v3712_v44 }
 0x1b3   :  { %2939 = vmatprep.mubr.msk.bf16.mxu0 %vm397_vm1, %v4219_v17  ;;  %v3102_v17 = vld [vmem:[%s4206_s3 + $0xd0] sm:$0xff]  }
 0x1b6   :  { %2916 = vmatmul.mubr.msk.bf16.vlgmr.msra.gmra.mxu1 %vm397_vm1, %v1032_v29  ;;  %v3129_v29 = vld [vmem:[%s4208_s5 + $0x34] ss:$8 sps:$4 sm:$0xff]  }
 0x1b7   :  { %2919 = vmatprep.mubr.msk.bf16.mxu1 %vm397_vm1, %v1033_v60  ;;  %2956 = vmatpush3.bf16.msra.mxu1 %v3099_v42  ;;  %v4221_v42 = vpack.c.bf16 %v3486_v11, %v3480_v8  ;;  %v1231_v8 = vpack.c.bf16 %v3539_v21, %v3516_v28  ;;  %v1030_v11 = vld [vmem:[#allocation2 + $0x120] sm:$0xff]  ;;  %v3110_v21 = vld [vmem:[%s4206_s3 + $0x110] sm:$0xff]  }
 0x1b8   :  { %2957 = vmatprep.subr.bf16.mxu1 %v3101_v22  ;;  %v3130_v60 = vld [vmem:[%s4208_s5 + $0x20] ss:$8 sps:$4 sm:$0xff]  }
 0x1ba   :  { %2940 = vmatmul.mubr.msk.bf16.vlgmr.msra.gmra.mxu0 %vm397_vm1, %v4220_v58 }
 0x1bb   :  { %2980 = vmatpush3.bf16.msra.mxu0 %v3100_v4  ;;  %2943 = vmatprep.mubr.msk.bf16.mxu0 %vm397_vm1, %v1227_v39  ;;  %v1037_v4 = vpack.c.bf16 %v480_v34, %v3657_v30  ;;  %v1038_v30 = vpack.c.bf16 %v1030_v11, %v3692_v18  ;;  %v3788_v34 = vld [vmem:[#allocation2 + $0x121] sm:$0xff]  ;;  %v1420_v18 = vpack.c.bf16 %v3599_v12, %v3585_v59  ;;  %v3135_v39 = vld [vmem:[%s4208_s5 + $0x14] ss:$8 sps:$4 sm:$0xff]  }
 0x1bc   :  { %2958 = vmatpush3.bf16.msra.mxu1 %v3101_v22  ;;  %2981 = vmatprep.subr.bf16.mxu0 %v3102_v17  ;;  %v1232_v28 = vpack.c.bf16 %v3788_v34, %v3541_v38  ;;  %v1410_v38 = vld [vmem:[#allocation2 + $0x82] sm:$0xff]  ;;  %v1617_v12 = vpack.c.bf16 %v1605_v9, %v3734_v43  ;;  %v3133_v43 = vld [vmem:[%s4208_s5 + $0x10] ss:$8 sps:$4 sm:$0xff]  }
 0x1bd   :  { %2959 = vmatprep.subr.bf16.mxu1 %v3103_v55  ;;  %v3112_v59 = vld [vmem:[%s4206_s3 + $0x108] sm:$0xff]  }
 0x1be   :  { %2920 = vmatmul.mubr.msk.bf16.gmra.mxu1 %vm397_vm1, %v1034_v62  ;;  %v3132_v22 = vld [vmem:[%s4208_s5 + $0x24] ss:$8 sps:$4 sm:$0xff]  }
 0x1bf   :  { %2923 = vmatprep.mubr.msk.bf16.mxu1 %vm397_vm1, %v1035_v45  ;;  %2982 = vmatpush3.bf16.msra.mxu0 %v3102_v17  ;;  %v3138_v62 = vld [vmem:[%s4208_s5 + $0x4] ss:$8 sps:$4 sm:$0xff]  }
 0x1c0   :  { %2960 = vmatpush3.bf16.msra.mxu1 %v3103_v55  ;;  %2983 = vmatprep.subr.bf16.mxu0 %v3104_v53 }
 0x1c1   :  { %2961 = vmatprep.subr.bf16.mxu1 %v3105_v46 }
 0x1c2   :  { %2944 = vmatmul.mubr.msk.bf16.gmra.mxu0 %vm397_vm1, %v1228_v48 }
 0x1c3   :  { %2947 = vmatprep.mubr.msk.bf16.mxu0 %vm397_vm1, %v4221_v42  ;;  %2984 = vmatpush3.bf16.msra.mxu0 %v3104_v53  ;;  %v3136_v53 = vld [vmem:[%s4208_s5] ss:$8 sps:$4 sm:$0xff]  }
 0x1c4   :  { %2962 = vmatpush3.bf16.msra.mxu1 %v3105_v46  ;;  %2985 = vmatprep.subr.bf16.mxu0 %v3106_v16 }
 0x1c5   :  { %3003 = vmatprep.subr.bf16.mxu1 %v3107_v0 }
 0x1c6   :  { %2924 = vmatmul.mubr.msk.bf16.gmra.mxu1 %vm397_vm1, %v1036_v50 }
 0x1c7   :  { %2927 = vmatprep.mubr.msk.bf16.mxu1 %vm397_vm1, %v1037_v4  ;;  %2986 = vmatpush3.bf16.msra.mxu0 %v3106_v16 }
 0x1c8   :  { %3027 = vmatprep.subr.bf16.mxu0 %v3108_v63 }
 0x1ca   :  { %2948 = vmatmul.mubr.msk.bf16.gmra.mxu0 %vm397_vm1, %v4222_v37 }
 0x1cb   :  { %2951 = vmatprep.mubr.msk.bf16.mxu0 %vm397_vm1, %v1231_v8 }
 0x1ce   :  { %2928 = vmatmul.mubr.msk.bf16.gmra.mxu1 %vm397_vm1, %v1038_v30 }
 0x1cf   :  { %2963 = vmatprep.mubr.msk.bf16.mxu1 %vm397_vm1, %v1419_v33 }
 0x1d2   :  { %2952 = vmatmul.mubr.msk.bf16.gmra.mxu0 %vm397_vm1, %v1232_v28 }
 0x1d3   :  { %2987 = vmatprep.mubr.msk.bf16.mxu0 %vm397_vm1, %v3574_v61  ;;  %v1422_v61 = vpack.c.bf16 %v1410_v38, %v3630_v23  ;;  %v1424_v23 = vpack.c.bf16 %v3686_v35, %v3672_v3  ;;  %v1613_v3 = vld [vmem:[#allocation2 + $0x130] sm:$0xff] }
 0x1d4   :  { %v1621_v49 = vpack.c.bf16 %v1613_v3, %v1030_v11  ;;  %v3127_v35 = vld [vmem:[%s4208_s5 + $0x30] ss:$8 sps:$4 sm:$0xff]  }
 0x1d6   :  { %2964 = vmatmul.mubr.msk.bf16.vlgmr.msra.gmra.mxu1 %vm397_vm1, %v1420_v18 }
 0x1d7   :  { %2967 = vmatprep.mubr.msk.bf16.mxu1 %vm397_vm1, %v1421_v19  ;;  %3004 = vmatpush3.bf16.msra.mxu1 %v3107_v0 }
 0x1d8   :  { %3005 = vmatprep.subr.bf16.mxu1 %v3109_v13 }
 0x1da   :  { %2988 = vmatmul.mubr.msk.bf16.vlgmr.msra.gmra.mxu0 %vm397_vm1, %v3583_v6  ;;  %v3113_v6 = vld [vmem:[%s4206_s3 + $0xe0] sm:$0xff]  }
 0x1db   :  { %3028 = vmatpush3.bf16.msra.mxu0 %v3108_v63  ;;  %2991 = vmatprep.mubr.msk.bf16.mxu0 %vm397_vm1, %v3624_v7  ;;  %v3114_v7 = vld [vmem:[%s4206_s3 + $0x100] sm:$0xff]  }
 0x1dc   :  { %3006 = vmatpush3.bf16.msra.mxu1 %v3109_v13  ;;  %3029 = vmatprep.subr.bf16.mxu0 %v3110_v21 }
 0x1dd   :  { %3007 = vmatprep.subr.bf16.mxu1 %v3111_v36 }
 0x1de   :  { %2968 = vmatmul.mubr.msk.bf16.gmra.mxu1 %vm397_vm1, %v1422_v61 }
 0x1df   :  { %2971 = vmatprep.mubr.msk.bf16.mxu1 %vm397_vm1, %v1423_v14  ;;  %3030 = vmatpush3.bf16.msra.mxu0 %v3110_v21 }
 0x1e0   :  { %3008 = vmatpush3.bf16.msra.mxu1 %v3111_v36  ;;  %3031 = vmatprep.subr.bf16.mxu0 %v3112_v59 }
 0x1e1   :  { %3009 = vmatprep.subr.bf16.mxu1 %v3113_v6 }
 0x1e2   :  { %2992 = vmatmul.mubr.msk.bf16.gmra.mxu0 %vm397_vm1, %v1617_v12 }
 0x1e3   :  { %2995 = vmatprep.mubr.msk.bf16.mxu0 %vm397_vm1, %v3661_v5  ;;  %3032 = vmatpush3.bf16.msra.mxu0 %v3112_v59  ;;  %v1426_v5 = vpack.c.bf16 %v1418_v31, %v3703_v26  ;;  %v1993_v26 = vld [vmem:[#allocation2 + $0x92] sm:$0xff] }
 0x1e4   :  { %3010 = vmatpush3.bf16.msra.mxu1 %v3113_v6  ;;  %3033 = vmatprep.subr.bf16.mxu0 %v3114_v7 }
 0x1e6   :  { %2972 = vmatmul.mubr.msk.bf16.gmra.mxu1 %vm397_vm1, %v1424_v23 }
 0x1e7   :  { %2975 = vmatprep.mubr.msk.bf16.mxu1 %vm397_vm1, %v1425_v24  ;;  %3034 = vmatpush3.bf16.msra.mxu0 %v3114_v7 }
 0x1ea   :  { %2996 = vmatmul.mubr.msk.bf16.gmra.mxu0 %vm397_vm1, %v3670_v52  ;;  %v3121_v52 = vld [vmem:[%s4208_s5 + $0x50] ss:$8 sps:$4 sm:$0xff]  }
 0x1eb   :  { %2999 = vmatprep.mubr.msk.bf16.mxu0 %vm397_vm1, %v3699_v1  ;;  %v1799_v1 = vld [vmem:[#allocation2 + $0x91] sm:$0xff] }
 0x1ee   :  { %2976 = vmatmul.mubr.msk.bf16.gmra.mxu1 %vm397_vm1, %v1426_v5 }
 0x1ef   :  { %3011 = vmatprep.mubr.msk.bf16.mxu1 %vm397_vm1, %v3444_v47  ;;  %v1811_v47 = vpack.c.bf16 %v1799_v1, %v3750_v25 }
 0x1f2   :  { %3000 = vmatmul.mubr.msk.bf16.gmra.mxu0 %vm397_vm1, %v1621_v49 }
 0x1f3   :  { %3035 = vmatprep.mubr.msk.bf16.mxu0 %vm397_vm1, %v3597_v10  ;;  %v2005_v10 = vpack.c.bf16 %v1993_v26, %v1410_v38 }
 0x1f6   :  { %3012 = vmatmul.mubr.msk.bf16.vlgmr.msra.gmra.mxu1 %vm397_vm1, %v3462_v54  ;;  %v1807_v54 = vld [vmem:[#allocation2 + $0x131] sm:$0xff] }
 0x1f7   :  { %3015 = vmatprep.mubr.msk.bf16.mxu1 %vm397_vm1, %v3560_v57  ;;  %v2001_v57 = vld [vmem:[#allocation2 + $0x132] sm:$0xff] }
 0x1fa   :  { %3036 = vmatmul.mubr.msk.bf16.vlgmr.msra.gmra.mxu0 %vm397_vm1, %v3606_v41  ;;  %v4223_v41 = vmov 0  }
 0x1fb   :  { %3039 = vmatprep.mubr.msk.bf16.mxu0 %vm397_vm1, %v3644_v32  ;;  %v2009_v32 = vpack.c.bf16 %v2001_v57, %v1418_v31 }
 0x1fe   :  { %3016 = vmatmul.mubr.msk.bf16.gmra.mxu1 %vm397_vm1, %v1811_v47 }
 0x1ff   :  { %3019 = vmatprep.mubr.msk.bf16.mxu1 %vm397_vm1, %v3497_v15  ;;  %v1815_v15 = vpack.c.bf16 %v1807_v54, %v3788_v34 }
 0x202   :  { %3040 = vmatmul.mubr.msk.bf16.gmra.mxu0 %vm397_vm1, %v2005_v10 }
 0x203   :  { %3043 = vmatprep.mubr.msk.bf16.mxu0 %vm397_vm1, %v3684_v2  ;;  %v3126_v2 = vld [vmem:[%s4208_s5 + $0x44] ss:$8 sps:$4 sm:$0xff]  }
 0x206   :  { %3020 = vmatmul.mubr.msk.bf16.gmra.mxu1 %vm397_vm1, %v3522_v51  ;;  %v3115_v51 = vld [vmem:[%s4208_s5 + $0x70] ss:$8 sps:$4 sm:$0xff]  }
 0x207   :  { %3023 = vmatprep.mubr.msk.bf16.mxu1 %vm397_vm1, %v3546_v40  ;;  %v3120_v40 = vld [vmem:[%s4208_s5 + $0x64] ss:$8 sps:$4 sm:$0xff]  }
 0x20a   :  { %3044 = vmatmul.mubr.msk.bf16.gmra.mxu0 %vm397_vm1, %v3690_v20  ;;  %v3117_v20 = vld [vmem:[%s4208_s5 + $0x74] ss:$8 sps:$4 sm:$0xff]  }
 0x20b   :  { %3047 = vmatprep.mubr.msk.bf16.mxu0 %vm397_vm1, %v3712_v44  ;;  %2335 = vmatprep.subr.bf16.mxu1 %v3117_v20  ;;  %v3118_v44 = vld [vmem:[%s4208_s5 + $0x60] ss:$8 sps:$4 sm:$0xff]  }
 0x20c   :  { %2336 = vmatpush1.bf16.msra.mxu1 %v3115_v51 }
 0x20d   :  { %2337 = vmatprep.subr.bf16.mxu1 %v3120_v40 }
 0x20e   :  { %3024 = vmatmul.mubr.msk.bf16.gmra.mxu1 %vm397_vm1, %v1815_v15 }
 0x20f   :  { %2367 = vmatprep.mubr.bf16.mxu1 %v4223_v41 }
 0x210   :  { %2338 = vmatpush1.bf16.msra.mxu1 %v3118_v44 }
 0x211   :  { %2339 = vmatprep.subr.bf16.mxu1 %v3123_v27 }
 0x212   :  { %3048 = vmatmul.mubr.msk.bf16.gmra.mxu0 %vm397_vm1, %v2009_v32 }
 0x214   :  { %2340 = vmatpush1.bf16.msra.mxu1 %v3121_v52 }
 0x215   :  { %2341 = vmatprep.subr.bf16.mxu1 %v3126_v2 }
 0x218   :  { %2342 = vmatpush1.bf16.msra.mxu1 %v3124_v56 }
 0x219   :  { %2343 = vmatprep.subr.bf16.mxu1 %v3129_v29 }
 0x21c   :  { %2344 = vmatpush1.bf16.msra.mxu1 %v3127_v35 }
 0x21d   :  { %2345 = vmatprep.subr.bf16.mxu1 %v3132_v22 }
 0x21e   :  { %v2845_v55 = vpop.f32.mrf.mxu0 }
 0x220   :  { %2346 = vmatpush1.bf16.msra.mxu1 %v3130_v60  ;;  %v613_v45 = vpop.f32.mrf.mxu0 }
 0x221   :  { %2347 = vmatprep.subr.bf16.mxu1 %v3135_v39 }
 0x222   :  { %v2846_v46 = vpop.f32.mrf.mxu0 }
 0x224   :  { %2348 = vmatpush1.bf16.msra.mxu1 %v3133_v43  ;;  %v616_v0 = vpop.f32.mrf.mxu0 }
 0x225   :  { %2349 = vmatprep.subr.bf16.mxu1 %v3138_v62 }
 0x228   :  { %2350 = vmatpush1.bf16.msra.mxu1 %v3136_v53 }
 0x23e   :  { %v2853_v17 = vpop.f32.mrf.mxu1 }
 0x240   :  { %v645_v58 = vpop.f32.mrf.mxu1 }
 0x242   :  { %v2854_v25 = vpop.f32.mrf.mxu1 }
 0x244   :  { %v648_v48 = vpop.f32.mrf.mxu1 }
 0x24e   :  { %v2857_v16 = vpop.f32.mrf.mxu1 }
 0x250   :  { %v661_v42 = vpop.f32.mrf.mxu1 }
 0x252   :  { %v2849_v50 = vpop.f32.mrf.mxu0  ;;  %v2858_v63 = vpop.f32.mrf.mxu1 }
 0x254   :  { %v629_v4 = vpop.f32.mrf.mxu0  ;;  %v664_v8 = vpop.f32.mrf.mxu1 }
 0x256   :  { %v2850_v11 = vpop.f32.mrf.mxu0  ;;  %v2869_v37 = vpop.f32.mrf.mxu1 }
 0x257   :  { %v767_v30 = vadd.f32 %v2869_v37, %v2845_v55 }
 0x258   :  { %v632_v33 = vpop.f32.mrf.mxu0  ;;  %v758_v34 = vpop.f32.mrf.mxu1 }
 0x259   :  { %v759_v28 = vadd.f32 %v758_v34, %v613_v45 }
 0x25a   :  { %v2870_v18 = vpop.f32.mrf.mxu1  ;;  %v2893_v13 = vpop.f32.mrf.mxu0 }
 0x25b   :  { %v770_v19 = vadd.f32 %v2870_v18, %v2846_v46  ;;  %v1001_v21 = vadd.f32 %v2893_v13, %v767_v30 }
 0x25c   :  { %v761_v38 = vpop.f32.mrf.mxu1  ;;  %v936_v36 = vpop.f32.mrf.mxu0 }
 0x25d   :  { %v762_v61 = vadd.f32 %v761_v38, %v616_v0  ;;  %v3926_v59 = vadd.f32 %v936_v36, %v759_v28 }
 0x25e   :  { %v2873_v14 = vpop.f32.mrf.mxu1  ;;  %v2894_v9 = vpop.f32.mrf.mxu0 }
 0x25f   :  { %v783_v6 = vadd.f32 %v2873_v14, %v2849_v50  ;;  %v1002_v12 = vadd.f32 %v2894_v9, %v770_v19 }
 0x260   :  { %v774_v7 = vpop.f32.mrf.mxu1  ;;  %v939_v23 = vpop.f32.mrf.mxu0 }
 0x261   :  { %v775_v24 = vadd.f32 %v774_v7, %v629_v4  ;;  %v3928_v31 = vadd.f32 %v939_v23, %v762_v61 }
 0x262   :  { %v2874_v5 = vpop.f32.mrf.mxu1  ;;  %v2897_v3 = vpop.f32.mrf.mxu0 }
 0x263   :  { %v786_v49 = vadd.f32 %v2874_v5, %v2850_v11  ;;  %v1005_v1 = vadd.f32 %v2897_v3, %v783_v6 }
 0x264   :  { %v777_v47 = vpop.f32.mrf.mxu1  ;;  %v952_v26 = vpop.f32.mrf.mxu0 }
 0x265   :  { %v778_v10 = vadd.f32 %v777_v47, %v632_v33  ;;  %v1003_v54 = vadd.f32 %v952_v26, %v775_v24 }
 0x266   :  { %v2877_v15 = vpop.f32.mrf.mxu1  ;;  %v2898_v57 = vpop.f32.mrf.mxu0 }
 0x267   :  { %v799_v32 = vadd.f32 %v2877_v15, %v2853_v17  ;;  %v1006_v51 = vadd.f32 %v2898_v57, %v786_v49 }
 0x268   :  { %v790_v20 = vpop.f32.mrf.mxu1  ;;  %v955_v44 = vpop.f32.mrf.mxu0 }
 0x269   :  { %v791_v40 = vadd.f32 %v790_v20, %v645_v58  ;;  %v1004_v52 = vadd.f32 %v955_v44, %v778_v10 }
 0x26a   :  { %v2878_v27 = vpop.f32.mrf.mxu1  ;;  %v2901_v56 = vpop.f32.mrf.mxu0 }
 0x26b   :  { %v802_v2 = vadd.f32 %v2878_v27, %v2854_v25  ;;  %v1009_v35 = vadd.f32 %v2901_v56, %v799_v32 }
 0x26c   :  { %v793_v29 = vpop.f32.mrf.mxu1  ;;  %v968_v22 = vpop.f32.mrf.mxu0 }
 0x26d   :  { %v794_v60 = vadd.f32 %v793_v29, %v648_v48  ;;  %v1007_v39 = vadd.f32 %v968_v22, %v791_v40 }
 0x26e   :  { %v2881_v43 = vpop.f32.mrf.mxu1  ;;  %v2902_v55 = vpop.f32.mrf.mxu0 }
 0x26f   :  { %v815_v62 = vadd.f32 %v2881_v43, %v2857_v16  ;;  %v1010_v53 = vadd.f32 %v2902_v55, %v802_v2 }
 0x270   :  { %v806_v45 = vpop.f32.mrf.mxu1  ;;  %v971_v46 = vpop.f32.mrf.mxu0 }
 0x271   :  { %v807_v17 = vadd.f32 %v806_v45, %v661_v42  ;;  %v1008_v0 = vadd.f32 %v971_v46, %v794_v60 }
 0x272   :  { %v2882_v50 = vpop.f32.mrf.mxu1  ;;  %v2905_v4 = vpop.f32.mrf.mxu0 }
 0x273   :  { %v818_v58 = vadd.f32 %v2882_v50, %v2858_v63  ;;  %v1013_v11 = vadd.f32 %v2905_v4, %v815_v62 }
 0x274   :  { %v809_v37 = vpop.f32.mrf.mxu1  ;;  %v984_v30 = vpop.f32.mrf.mxu0 }
 0x275   :  { %v810_v25 = vadd.f32 %v809_v37, %v664_v8  ;;  %v1011_v33 = vadd.f32 %v984_v30, %v807_v17 }
 0x276   :  { %v2906_v34 = vpop.f32.mrf.mxu0  ;;  %v2917_v28 = vpop.f32.mrf.mxu1 }
 0x277   :  { %v1014_v48 = vadd.f32 %v2906_v34, %v818_v58  ;;  %v1195_v18 = vadd.f32 %v2917_v28, %v1001_v21 }
 0x278   :  { %v987_v13 = vpop.f32.mrf.mxu0  ;;  %v3930_v19 = vpop.f32.mrf.mxu1 }
 0x279   :  { %v1012_v16 = vadd.f32 %v987_v13, %v810_v25 }
 0x27a   :  { %v2918_v38 = vpop.f32.mrf.mxu1  ;;  %v2941_v36 = vpop.f32.mrf.mxu0 }
 0x27b   :  { %v1196_v42 = vadd.f32 %v2918_v38, %v1002_v12  ;;  %v3932_v61 = vadd.f32 %v2941_v36, %v1195_v18 }
 0x27c   :  { %v3934_v14 = vpop.f32.mrf.mxu1  ;;  %v3936_v63 = vpop.f32.mrf.mxu0 }
 0x27e   :  { %v2921_v9 = vpop.f32.mrf.mxu1  ;;  %v2942_v8 = vpop.f32.mrf.mxu0 }
 0x27f   :  { %v1199_v6 = vadd.f32 %v2921_v9, %v1005_v1  ;;  %v3938_v7 = vadd.f32 %v2942_v8, %v1196_v42 }
 0x280   :  { %v1146_v23 = vpop.f32.mrf.mxu1  ;;  %v3940_v21 = vpop.f32.mrf.mxu0 }
 0x281   :  { %v1197_v24 = vadd.f32 %v1146_v23, %v1003_v54 }
 0x282   :  { %v2922_v5 = vpop.f32.mrf.mxu1  ;;  %v2945_v3 = vpop.f32.mrf.mxu0 }
 0x283   :  { %v1200_v49 = vadd.f32 %v2922_v5, %v1006_v51  ;;  %v3942_v47 = vadd.f32 %v2945_v3, %v1199_v6 }
 0x284   :  { %v1149_v12 = vpop.f32.mrf.mxu1  ;;  %v1340_v26 = vpop.f32.mrf.mxu0 }
 0x285   :  { %v1198_v10 = vadd.f32 %v1149_v12, %v1004_v52  ;;  %v3944_v15 = vadd.f32 %v1340_v26, %v1197_v24 }
 0x286   :  { %v2925_v57 = vpop.f32.mrf.mxu1  ;;  %v2946_v32 = vpop.f32.mrf.mxu0 }
 0x287   :  { %v1203_v20 = vadd.f32 %v2925_v57, %v1009_v35  ;;  %v3946_v1 = vadd.f32 %v2946_v32, %v1200_v49 }
 0x288   :  { %v1162_v44 = vpop.f32.mrf.mxu1  ;;  %v1343_v40 = vpop.f32.mrf.mxu0 }
 0x289   :  { %v1201_v27 = vadd.f32 %v1162_v44, %v1007_v39  ;;  %v3948_v56 = vadd.f32 %v1343_v40, %v1198_v10 }
 0x28a   :  { %v2926_v54 = vpop.f32.mrf.mxu1  ;;  %v2949_v2 = vpop.f32.mrf.mxu0 }
 0x28b   :  { %v1204_v51 = vadd.f32 %v2926_v54, %v1010_v53  ;;  %v3950_v29 = vadd.f32 %v2949_v2, %v1203_v20 }
 0x28c   :  { %v1165_v22 = vpop.f32.mrf.mxu1  ;;  %v1356_v60 = vpop.f32.mrf.mxu0 }
 0x28d   :  { %v1202_v52 = vadd.f32 %v1165_v22, %v1008_v0  ;;  %v3952_v43 = vadd.f32 %v1356_v60, %v1201_v27 }
 0x28e   :  { %v2929_v55 = vpop.f32.mrf.mxu1  ;;  %v2950_v62 = vpop.f32.mrf.mxu0 }
 0x28f   :  { %v1207_v35 = vadd.f32 %v2929_v55, %v1013_v11  ;;  %v3954_v45 = vadd.f32 %v2950_v62, %v1204_v51  ;;  %v1193_v55 = vadd.f32 %v3930_v19, %v3926_v59 }
 0x290   :  { %v1178_v46 = vpop.f32.mrf.mxu1  ;;  %v1359_v17 = vpop.f32.mrf.mxu0 }
 0x291   :  { %v1205_v39 = vadd.f32 %v1178_v46, %v1011_v33  ;;  %v3956_v50 = vadd.f32 %v1359_v17, %v1202_v52  ;;  %v1387_v17 = vadd.f32 %v3936_v63, %v1193_v55 }
 0x292   :  { %v2930_v4 = vpop.f32.mrf.mxu1  ;;  %v2953_v58 = vpop.f32.mrf.mxu0 }
 0x293   :  { %v1208_v53 = vadd.f32 %v2930_v4, %v1014_v48  ;;  %v1401_v37 = vadd.f32 %v2953_v58, %v1207_v35 }
 0x294   :  { %v1181_v30 = vpop.f32.mrf.mxu1  ;;  %v1372_v25 = vpop.f32.mrf.mxu0 }
 0x295   :  { %v1206_v34 = vadd.f32 %v1181_v30, %v1012_v16  ;;  %v3958_v0 = vadd.f32 %v1372_v25, %v1205_v39 }
 0x296   :  { %v2954_v28 = vpop.f32.mrf.mxu0  ;;  %v2965_v18 = vpop.f32.mrf.mxu1 }
 0x297   :  { %v3960_v13 = vadd.f32 %v2954_v28, %v1208_v53  ;;  %v1583_v39 = vadd.f32 %v2965_v18, %v3932_v61  ;;  %v1194_v53 = vadd.f32 %v3934_v14, %v3928_v31 }
 0x298   :  { %v1375_v11 = vpop.f32.mrf.mxu0  ;;  %v1518_v38 = vpop.f32.mrf.mxu1 }
 0x299   :  { %v3962_v36 = vadd.f32 %v1375_v11, %v1206_v34  ;;  %v1388_v19 = vadd.f32 %v3940_v21, %v1194_v53 }
 0x29a   :  { %v2966_v33 = vpop.f32.mrf.mxu1  ;;  %v2989_v42 = vpop.f32.mrf.mxu0 }
 0x29b   :  { %v1778_v30 = vadd.f32 %v2989_v42, %v1583_v39  ;;  %v1584_v34 = vadd.f32 %v2966_v33, %v3938_v7 }
 0x29c   :  { %v1521_v9 = vpop.f32.mrf.mxu1  ;;  %v1713_v8 = vpop.f32.mrf.mxu0 }
 0x29d   :  { %v1582_v61 = vadd.f32 %v1521_v9, %v1388_v19 }
 0x29e   :  { %v2969_v6 = vpop.f32.mrf.mxu1  ;;  %v2990_v48 = vpop.f32.mrf.mxu0 }
 0x29f   :  { %v1779_v18 = vadd.f32 %v2990_v48, %v1584_v34  ;;  %v1587_v7 = vadd.f32 %v2969_v6, %v3942_v47 }
 0x2a0   :  { %v1534_v23 = vpop.f32.mrf.mxu1  ;;  %v1716_v24 = vpop.f32.mrf.mxu0 }
 0x2a1   :  { %v1777_v31 = vadd.f32 %v1716_v24, %v1582_v61  ;;  %v1585_v9 = vadd.f32 %v1534_v23, %v3944_v15 }
 0x2a2   :  { %v2970_v5 = vpop.f32.mrf.mxu1  ;;  %v2993_v16 = vpop.f32.mrf.mxu0 }
 0x2a3   :  { %v1782_v48 = vadd.f32 %v2993_v16, %v1587_v7 }
 0x2a4   :  { %v3964_v3 = vpop.f32.mrf.mxu1  ;;  %v1729_v49 = vpop.f32.mrf.mxu0 }
 0x2a5   :  { %v1586_v34 = vadd.f32 %v3964_v3, %v3948_v56 }
 0x2a6   :  { %v3966_v12 = vpop.f32.mrf.mxu1  ;;  %v3968_v26 = vpop.f32.mrf.mxu0 }
 0x2a8   :  { %v3970_v10 = vpop.f32.mrf.mxu1  ;;  %v3972_v57 = vpop.f32.mrf.mxu0 }
 0x2aa   :  { %v3974_v32 = vpop.f32.mrf.mxu1  ;;  %v3976_v20 = vpop.f32.mrf.mxu0 }
 0x2ac   :  { %v3978_v44 = vpop.f32.mrf.mxu1  ;;  %v3980_v40 = vpop.f32.mrf.mxu0 }
 0x2ae   :  { %v2977_v27 = vpop.f32.mrf.mxu1  ;;  %v3982_v54 = vpop.f32.mrf.mxu0 }
 0x2af   :  { %v1595_v2 = vadd.f32 %v2977_v27, %v1401_v37  ;;  %v1581_v37 = vadd.f32 %v1518_v38, %v1387_v17  ;;  %v4011_v38 = vld [vmem:[%s4209_s4] ss:$0 sm:$0xff] }
 0x2b0   :  { %v3984_v51 = vpop.f32.mrf.mxu1  ;;  %v3986_v22 = vpop.f32.mrf.mxu0 }
 0x2b1   :  { %v1776_v28 = vadd.f32 %v1713_v8, %v1581_v37 }
 0x2b2   :  { %v3988_v60 = vpop.f32.mrf.mxu1  ;;  %v3001_v52 = vpop.f32.mrf.mxu0 }
 0x2b3   :  { %v3992_v62 = vadd.f32 %v3001_v52, %v1595_v2 }
 0x2b4   :  { %v3994_v35 = vpop.f32.mrf.mxu1  ;;  %v3996_v46 = vpop.f32.mrf.mxu0 }
 0x2b6   :  { %v4000_v4 = vpop.f32.mrf.mxu0  ;;  %v3013_v58 = vpop.f32.mrf.mxu1 }
 0x2b7   :  { %4224 = vst [vmem:[#allocation4_spill] sm:$0xff] %v4000_v4  ;;  %v1972_v11 = vadd.f32 %v3013_v58, %v1778_v30 }
 0x2b8   :  { %v4004_v25 = vpop.f32.mrf.mxu0  ;;  %v1907_v59 = vpop.f32.mrf.mxu1 }
 0x2b9   :  { %v1970_v2 = vadd.f32 %v1907_v59, %v1776_v28  ;;  %v1780_v59 = vadd.f32 %v1729_v49, %v1585_v9  ;;  %v1591_v49 = vadd.f32 %v3966_v12, %v3950_v29  ;;  %v1592_v29 = vadd.f32 %v3974_v32, %v3954_v45 }
 0x2ba   :  { %v3014_v63 = vpop.f32.mrf.mxu1  ;;  %v3037_v27 = vpop.f32.mrf.mxu0 }
 0x2bb   :  { %v2166_v52 = vadd.f32 %v3037_v27, %v1972_v11  ;;  %v1973_v14 = vadd.f32 %v3014_v63, %v1779_v18  ;;  %v1781_v18 = vadd.f32 %v3972_v57, %v1586_v34 }
 0x2bc   :  { %v1910_v55 = vpop.f32.mrf.mxu1  ;;  %v2101_v4 = vpop.f32.mrf.mxu0 }
 0x2bd   :  { %v2164_v21 = vadd.f32 %v2101_v4, %v1970_v2  ;;  %v1971_v8 = vadd.f32 %v1910_v55, %v1777_v31  ;;  %v2189_v39 = vadd.f32 %v4011_v38, %v2166_v52  ;;  %v1588_v4 = vadd.f32 %v2970_v5, %v3946_v1 }
 0x2be   :  { %v3017_v33 = vpop.f32.mrf.mxu1  ;;  %v3038_v42 = vpop.f32.mrf.mxu0 }
 0x2bf   :  { %v2167_v17 = vadd.f32 %v3038_v42, %v1973_v14  ;;  %v2187_v53 = vadd.f32 %v4011_v38, %v2164_v21  ;;  %v1976_v47 = vadd.f32 %v3017_v33, %v1782_v48  ;;  %v1783_v16 = vadd.f32 %v3968_v26, %v1588_v4 }
 0x2c0   :  { %v1923_v58 = vpop.f32.mrf.mxu1  ;;  %v2104_v24 = vpop.f32.mrf.mxu0  ;;  %v2205_v28 = vmax.f32 %v2189_v39, 0.0  ;;  %v1589_v26 = vadd.f32 %v3970_v10, %v3952_v43  ;;  %v1786_v21 = vadd.f32 %v3976_v20, %v1591_v49  ;;  %v1590_v20 = vadd.f32 %v3978_v44, %v3956_v50 }
 0x2c1   :  { %v2190_v37 = vadd.f32 %v4011_v38, %v2167_v17  ;;  %v2165_v30 = vadd.f32 %v2104_v24, %v1971_v8  ;;  %v1974_v11 = vadd.f32 %v1923_v58, %v1780_v59  ;;  %v2203_v1 = vmax.f32 %v2187_v53, 0.0 }
 0x2c2   :  { %v3018_v6 = vpop.f32.mrf.mxu1  ;;  %v3041_v19 = vpop.f32.mrf.mxu0  ;;  %v1784_v12 = vadd.f32 %v3980_v40, %v1589_v26  ;;  %v1787_v39 = vadd.f32 %v3982_v54, %v1592_v29 }
 0x2c3   :  { %v2206_v15 = vmax.f32 %v2190_v37, 0.0  ;;  %v2188_v23 = vadd.f32 %v4011_v38, %v2165_v30  ;;  %v2170_v63 = vadd.f32 %v3041_v19, %v1976_v47  ;;  %v1977_v2 = vadd.f32 %v3018_v6, %v1783_v16 }
 0x2c4   :  { %v1926_v27 = vpop.f32.mrf.mxu1  ;;  %v2117_v61 = vpop.f32.mrf.mxu0  ;;  %v1785_v30 = vadd.f32 %v3986_v22, %v1590_v20  ;;  %v1593_v6 = vadd.f32 %v3984_v51, %v3958_v0 }
 0x2c5   :  { %v2204_v5 = vmax.f32 %v2188_v23, 0.0  ;;  %v2168_v52 = vadd.f32 %v2117_v61, %v1974_v11  ;;  %v2220_v55 = vpack.c.bf16 %v2206_v15, %v2205_v28  ;;  %v1975_v14 = vadd.f32 %v1926_v27, %v1781_v18 }
 0x2c6   :  { %v3021_v56 = vpop.f32.mrf.mxu1  ;;  %v3042_v3 = vpop.f32.mrf.mxu0  ;;  %v2193_v7 = vadd.f32 %v4011_v38, %v2170_v63  ;;  %v1596_v23 = vadd.f32 %v3988_v60, %v3960_v13  ;;  %v1788_v16 = vadd.f32 %v3996_v46, %v1593_v6  ;;  %v1594_v18 = vadd.f32 %v3994_v35, %v3962_v36 }
 0x2c7   :  { %v2219_v31 = vpack.c.bf16 %v2204_v5, %v2203_v1  ;;  %v2171_v57 = vadd.f32 %v3042_v3, %v1977_v2  ;;  %v2191_v17 = vadd.f32 %v4011_v38, %v2168_v52  ;;  %v1980_v9 = vadd.f32 %v3021_v56, %v1786_v21  ;;  %v4225_v1 = vld [vmem:[#allocation4_spill] sm:$0xff] }
 0x2c8   :  { %v1939_v33 = vpop.f32.mrf.mxu1  ;;  %v2120_v42 = vpop.f32.mrf.mxu0  ;;  %v2209_v32 = vmax.f32 %v2193_v7, 0.0  ;;  %v1791_v13 = vadd.f32 %v4225_v1, %v1596_v23 }
 0x2c9   :  { %v2169_v8 = vadd.f32 %v2120_v42, %v1975_v14  ;;  %2368 = vmatmul.mubr.bf16.vlgmr.msra.gmra.mxu1 %v2219_v31  ;;  %v2194_v43 = vadd.f32 %v4011_v38, %v2171_v57  ;;  %v1978_v58 = vadd.f32 %v1939_v33, %v1784_v12  ;;  %v2207_v19 = vmax.f32 %v2191_v17, 0.0 }
 0x2ca   :  { %v3022_v10 = vpop.f32.mrf.mxu1  ;;  %v3045_v48 = vpop.f32.mrf.mxu0  ;;  %2377 = vmatprep.mubr.bf16.mxu1 %v4223_v41 }
 0x2cb   :  { %v2192_v45 = vadd.f32 %v4011_v38, %v2169_v8  ;;  %v2210_v40 = vmax.f32 %v2194_v43, 0.0  ;;  %v2174_v24 = vadd.f32 %v3045_v48, %v1980_v9  ;;  %v1981_v59 = vadd.f32 %v3022_v10, %v1787_v39 }
 0x2cc   :  { %v1942_v53 = vpop.f32.mrf.mxu1  ;;  %v2133_v37 = vpop.f32.mrf.mxu0 }
 0x2cd   :  { %v2208_v4 = vmax.f32 %v2192_v45, 0.0  ;;  %v2172_v47 = vadd.f32 %v2133_v37, %v1978_v58  ;;  %v2222_v54 = vpack.c.bf16 %v2210_v40, %v2209_v32  ;;  %v1979_v34 = vadd.f32 %v1942_v53, %v1785_v30  ;;  %v4226_v58 = vld [vmem:[#allocation3_spill] sm:$0xff] }
 0x2ce   :  { %v3025_v50 = vpop.f32.mrf.mxu1  ;;  %v3046_v44 = vpop.f32.mrf.mxu0  ;;  %v2197_v28 = vadd.f32 %v4011_v38, %v2174_v24  ;;  %v4227_v45 = vsub.s32 0, %v4226_v58  ;;  %v4228_v40 = vsub.s32 1, %v4226_v58 }
 0x2cf   :  { %v2175_v15 = vadd.f32 %v3046_v44, %v1981_v59  ;;  %v2221_v63 = vpack.c.bf16 %v2208_v4, %v2207_v19  ;;  %v2195_v27 = vadd.f32 %v4011_v38, %v2172_v47  ;;  %v1984_v0 = vadd.f32 %v3025_v50, %v3992_v62 }
 0x2d0   :  { %v1955_v22 = vpop.f32.mrf.mxu1  ;;  %v2136_v11 = vpop.f32.mrf.mxu0  ;;  %v1789_v62 = vadd.f32 %v4004_v25, %v1594_v18  ;;  %v2213_v56 = vmax.f32 %v2197_v28, 0.0 }
 0x2d1   :  { %v2198_v51 = vadd.f32 %v4011_v38, %v2175_v15  ;;  %v2173_v61 = vadd.f32 %v2136_v11, %v1979_v34  ;;  %2378 = vmatmul.mubr.bf16.gmra.mxu1 %v2220_v55  ;;  %v1982_v49 = vadd.f32 %v1955_v22, %v1788_v16  ;;  %v2211_v55 = vmax.f32 %v2195_v27, 0.0 }
 0x2d2   :  { %v3026_v60 = vpop.f32.mrf.mxu1  ;;  %v3049_v46 = vpop.f32.mrf.mxu0  ;;  %2387 = vmatprep.mubr.bf16.mxu1 %v4223_v41 }
 0x2d3   :  { %v2214_v5 = vmax.f32 %v2198_v51, 0.0  ;;  %v2196_v2 = vadd.f32 %v4011_v38, %v2173_v61  ;;  %v2178_v52 = vadd.f32 %v3049_v46, %v1984_v0  ;;  %v1985_v14 = vadd.f32 %v3026_v60, %v1791_v13 }
 0x2d4   :  { %v1958_v3 = vpop.f32.mrf.mxu1  ;;  %v2149_v26 = vpop.f32.mrf.mxu0 }
 0x2d5   :  { %v2212_v31 = vmax.f32 %v2196_v2, 0.0  ;;  %v2176_v36 = vadd.f32 %v2149_v26, %v1982_v49  ;;  %v2224_v21 = vpack.c.bf16 %v2214_v5, %v2213_v56  ;;  %v2201_v7 = vadd.f32 %v4011_v38, %v2178_v52 }
 0x2d6   :  { %v3050_v35 = vpop.f32.mrf.mxu0  ;;  %v1983_v57 = vadd.f32 %v1958_v3, %v1789_v62 }
 0x2d7   :  { %v2179_v33 = vadd.f32 %v3050_v35, %v1985_v14  ;;  %v2223_v42 = vpack.c.bf16 %v2212_v31, %v2211_v55  ;;  %v2199_v12 = vadd.f32 %v4011_v38, %v2176_v36  ;;  %v2217_v17 = vmax.f32 %v2201_v7, 0.0 }
 0x2d8   :  { %v2152_v29 = vpop.f32.mrf.mxu0 }
 0x2d9   :  { %v2202_v8 = vadd.f32 %v4011_v38, %v2179_v33  ;;  %v2177_v25 = vadd.f32 %v2152_v29, %v1983_v57  ;;  %2388 = vmatmul.mubr.bf16.gmra.mxu1 %v2221_v63  ;;  %v2215_v10 = vmax.f32 %v2199_v12, 0.0 }
 0x2da   :  { %2397 = vmatprep.mubr.bf16.mxu1 %v4223_v41 }
 0x2db   :  { %v2218_v9 = vmax.f32 %v2202_v8, 0.0  ;;  %v2200_v43 = vadd.f32 %v4011_v38, %v2177_v25  ;;  %v2243_v38 = vld [vmem:[%s4210_s6] sm:$0x3] }
 0x2dc   :  { %v4070_v32 = vrot.slane %v2243_v38, %v4227_v45  ;;  %v4074_v24 = vrot.slane %v2243_v38, %v4228_v40 }
 0x2dd   :  { %v2216_v48 = vmax.f32 %v2200_v43, 0.0  ;;  %v2226_v20 = vpack.c.bf16 %v2218_v9, %v2217_v17 }
 0x2df   :  { %v2225_v39 = vpack.c.bf16 %v2216_v48, %v2215_v10 }
 0x2e1   :  { %2398 = vmatmul.mubr.bf16.gmra.mxu1 %v2222_v54 }
 0x2e2   :  { %2407 = vmatprep.mubr.bf16.mxu1 %v4223_v41 }
 0x2e9   :  { %2408 = vmatmul.mubr.bf16.gmra.mxu1 %v2223_v42 }
 0x2ea   :  { %2417 = vmatprep.mubr.bf16.mxu1 %v4223_v41 }
 0x2f1   :  { %2418 = vmatmul.mubr.bf16.gmra.mxu1 %v2224_v21 }
 0x2f2   :  { %2427 = vmatprep.mubr.bf16.mxu1 %v4223_v41 }
 0x2f9   :  { %2428 = vmatmul.mubr.bf16.gmra.mxu1 %v2225_v39 }
 0x2fa   :  { %2437 = vmatprep.mubr.bf16.mxu1 %v4223_v41 }
 0x301   :  { %2438 = vmatmul.mubr.bf16.gmra.mxu1 %v2226_v20 }
 0x389   :  { %v2369_v53 = vpop.f32.mrf.mxu1 }
 0x38a   :  { %v2370_v37 = vadd.f32 %v2369_v53, %v4070_v32 }
 0x38b   :  { %v2371_v30 = vpop.f32.mrf.mxu1 }
 0x38c   :  { %v2448_v4 = vmax.f32 %v2370_v37, 0.0  ;;  %v2372_v41 = vadd.f32 %v2371_v30, %v4074_v24 }
 0x38d   :  { %v2373_v59 = vpop.f32.mrf.mxu1 }
 0x38e   :  { %2480 = vst [vmem:[%s4211_s7] sm:$0xff] %v2448_v4  ;;  %v2449_v47 = vmax.f32 %v2372_v41, 0.0  ;;  %v2374_v6 = vadd.f32 %v2373_v59, %v4070_v32 }
 0x38f   :  { %v2375_v19 = vpop.f32.mrf.mxu1 }
 0x390   :  { %2481 = vst [vmem:[%s4211_s7 + $0x8] sm:$0xff] %v2449_v47  ;;  %v2450_v50 = vmax.f32 %v2374_v6, 0.0  ;;  %v2376_v44 = vadd.f32 %v2375_v19, %v4074_v24 }
 0x391   :  { %v2379_v54 = vpop.f32.mrf.mxu1 }
 0x392   :  { %2482 = vst [vmem:[%s4211_s7 + $0x10] sm:$0xff] %v2450_v50  ;;  %v2451_v34 = vmax.f32 %v2376_v44, 0.0  ;;  %v2380_v15 = vadd.f32 %v2379_v54, %v4070_v32 }
 0x393   :  { %v2381_v23 = vpop.f32.mrf.mxu1 }
 0x394   :  { %2483 = vst [vmem:[%s4211_s7 + $0x18] sm:$0xff] %v2451_v34  ;;  %v2452_v16 = vmax.f32 %v2380_v15, 0.0  ;;  %v2382_v28 = vadd.f32 %v2381_v23, %v4074_v24 }
 0x395   :  { %v2383_v22 = vpop.f32.mrf.mxu1 }
 0x396   :  { %2484 = vst [vmem:[%s4211_s7 + $0x20] sm:$0xff] %v2452_v16  ;;  %v2453_v11 = vmax.f32 %v2382_v28, 0.0  ;;  %v2384_v63 = vadd.f32 %v2383_v22, %v4070_v32 }
 0x397   :  { %v2385_v27 = vpop.f32.mrf.mxu1 }
 0x398   :  { %2485 = vst [vmem:[%s4211_s7 + $0x28] sm:$0xff] %v2453_v11  ;;  %v2454_v0 = vmax.f32 %v2384_v63, 0.0  ;;  %v2386_v51 = vadd.f32 %v2385_v27, %v4074_v24 }
 0x399   :  { %v2389_v61 = vpop.f32.mrf.mxu1 }
 0x39a   :  { %2486 = vst [vmem:[%s4211_s7 + $0x30] sm:$0xff] %v2454_v0  ;;  %v2455_v18 = vmax.f32 %v2386_v51, 0.0  ;;  %v2390_v1 = vadd.f32 %v2389_v61, %v4070_v32 }
 0x39b   :  { %v2391_v13 = vpop.f32.mrf.mxu1 }
 0x39c   :  { %2487 = vst [vmem:[%s4211_s7 + $0x38] sm:$0xff] %v2455_v18  ;;  %v2456_v60 = vmax.f32 %v2390_v1, 0.0  ;;  %v2392_v46 = vadd.f32 %v2391_v13, %v4074_v24 }
 0x39d   :  { %v2393_v5 = vpop.f32.mrf.mxu1 }
 0x39e   :  { %2488 = vst [vmem:[%s4211_s7 + $0x40] sm:$0xff] %v2456_v60  ;;  %v2457_v49 = vmax.f32 %v2392_v46, 0.0  ;;  %v2394_v2 = vadd.f32 %v2393_v5, %v4070_v32 }
 0x39f   :  { %v2395_v52 = vpop.f32.mrf.mxu1 }
 0x3a0   :  { %2489 = vst [vmem:[%s4211_s7 + $0x48] sm:$0xff] %v2457_v49  ;;  %v2458_v62 = vmax.f32 %v2394_v2, 0.0  ;;  %v2396_v56 = vadd.f32 %v2395_v52, %v4074_v24 }
 0x3a1   :  { %v2399_v3 = vpop.f32.mrf.mxu1 }
 0x3a2   :  { %2490 = vst [vmem:[%s4211_s7 + $0x50] sm:$0xff] %v2458_v62  ;;  %v2459_v26 = vmax.f32 %v2396_v56, 0.0  ;;  %v2400_v55 = vadd.f32 %v2399_v3, %v4070_v32 }
 0x3a3   :  { %v2401_v31 = vpop.f32.mrf.mxu1 }
 0x3a4   :  { %2491 = vst [vmem:[%s4211_s7 + $0x58] sm:$0xff] %v2459_v26  ;;  %v2460_v14 = vmax.f32 %v2400_v55, 0.0  ;;  %v2402_v36 = vadd.f32 %v2401_v31, %v4074_v24 }
 0x3a5   :  { %v2403_v35 = vpop.f32.mrf.mxu1 }
 0x3a6   :  { %2492 = vst [vmem:[%s4211_s7 + $0x60] sm:$0xff] %v2460_v14  ;;  %v2461_v21 = vmax.f32 %v2402_v36, 0.0  ;;  %v2404_v7 = vadd.f32 %v2403_v35, %v4070_v32 }
 0x3a7   :  { %v2405_v57 = vpop.f32.mrf.mxu1 }
 0x3a8   :  { %2493 = vst [vmem:[%s4211_s7 + $0x68] sm:$0xff] %v2461_v21  ;;  %v2462_v33 = vmax.f32 %v2404_v7, 0.0  ;;  %v2406_v42 = vadd.f32 %v2405_v57, %v4074_v24 }
 0x3a9   :  { %v2409_v29 = vpop.f32.mrf.mxu1 }
 0x3aa   :  { %2494 = vst [vmem:[%s4211_s7 + $0x70] sm:$0xff] %v2462_v33  ;;  %v2463_v12 = vmax.f32 %v2406_v42, 0.0  ;;  %v2410_v8 = vadd.f32 %v2409_v29, %v4070_v32 }
 0x3ab   :  { %v2411_v25 = vpop.f32.mrf.mxu1 }
 0x3ac   :  { %2495 = vst [vmem:[%s4211_s7 + $0x78] sm:$0xff] %v2463_v12  ;;  %v2464_v17 = vmax.f32 %v2410_v8, 0.0  ;;  %v2412_v9 = vadd.f32 %v2411_v25, %v4074_v24 }
 0x3ad   :  { %v2413_v43 = vpop.f32.mrf.mxu1 }
 0x3ae   :  { %2496 = vst [vmem:[%s4211_s7 + $0x80] sm:$0xff] %v2464_v17  ;;  %v2465_v10 = vmax.f32 %v2412_v9, 0.0  ;;  %v2414_v48 = vadd.f32 %v2413_v43, %v4070_v32 }
 0x3af   :  { %v2415_v20 = vpop.f32.mrf.mxu1 }
 0x3b0   :  { %2497 = vst [vmem:[%s4211_s7 + $0x88] sm:$0xff] %v2465_v10  ;;  %v2466_v39 = vmax.f32 %v2414_v48, 0.0  ;;  %v2416_v38 = vadd.f32 %v2415_v20, %v4074_v24 }
 0x3b1   :  { %v2419_v58 = vpop.f32.mrf.mxu1 }
 0x3b2   :  { %2498 = vst [vmem:[%s4211_s7 + $0x90] sm:$0xff] %v2466_v39  ;;  %v2467_v45 = vmax.f32 %v2416_v38, 0.0  ;;  %v2420_v40 = vadd.f32 %v2419_v58, %v4070_v32 }
 0x3b3   :  { %v2421_v53 = vpop.f32.mrf.mxu1 }
 0x3b4   :  { %2499 = vst [vmem:[%s4211_s7 + $0x98] sm:$0xff] %v2467_v45  ;;  %v2468_v37 = vmax.f32 %v2420_v40, 0.0  ;;  %v2422_v30 = vadd.f32 %v2421_v53, %v4074_v24 }
 0x3b5   :  { %v2423_v4 = vpop.f32.mrf.mxu1 }
 0x3b6   :  { %2500 = vst [vmem:[%s4211_s7 + $0xa0] sm:$0xff] %v2468_v37  ;;  %v2469_v41 = vmax.f32 %v2422_v30, 0.0  ;;  %v2424_v59 = vadd.f32 %v2423_v4, %v4070_v32 }
 0x3b7   :  { %v2425_v47 = vpop.f32.mrf.mxu1 }
 0x3b8   :  { %2501 = vst [vmem:[%s4211_s7 + $0xa8] sm:$0xff] %v2469_v41  ;;  %v2470_v6 = vmax.f32 %v2424_v59, 0.0  ;;  %v2426_v19 = vadd.f32 %v2425_v47, %v4074_v24 }
 0x3b9   :  { %v2429_v50 = vpop.f32.mrf.mxu1 }
 0x3ba   :  { %2502 = vst [vmem:[%s4211_s7 + $0xb0] sm:$0xff] %v2470_v6  ;;  %v2471_v44 = vmax.f32 %v2426_v19, 0.0  ;;  %v2430_v54 = vadd.f32 %v2429_v50, %v4070_v32 }
 0x3bb   :  { %v2431_v34 = vpop.f32.mrf.mxu1 }
 0x3bc   :  { %2503 = vst [vmem:[%s4211_s7 + $0xb8] sm:$0xff] %v2471_v44  ;;  %v2472_v15 = vmax.f32 %v2430_v54, 0.0  ;;  %v2432_v23 = vadd.f32 %v2431_v34, %v4074_v24 }
 0x3bd   :  { %v2433_v16 = vpop.f32.mrf.mxu1 }
 0x3be   :  { %2504 = vst [vmem:[%s4211_s7 + $0xc0] sm:$0xff] %v2472_v15  ;;  %v2473_v28 = vmax.f32 %v2432_v23, 0.0  ;;  %v2434_v22 = vadd.f32 %v2433_v16, %v4070_v32 }
 0x3bf   :  { %v2435_v11 = vpop.f32.mrf.mxu1 }
 0x3c0   :  { %2505 = vst [vmem:[%s4211_s7 + $0xc8] sm:$0xff] %v2473_v28  ;;  %v2474_v63 = vmax.f32 %v2434_v22, 0.0  ;;  %v2436_v27 = vadd.f32 %v2435_v11, %v4074_v24 }
 0x3c1   :  { %v2439_v0 = vpop.f32.mrf.mxu1 }
 0x3c2   :  { %2506 = vst [vmem:[%s4211_s7 + $0xd0] sm:$0xff] %v2474_v63  ;;  %v2475_v51 = vmax.f32 %v2436_v27, 0.0  ;;  %v2440_v61 = vadd.f32 %v2439_v0, %v4070_v32 }
 0x3c3   :  { %v2441_v18 = vpop.f32.mrf.mxu1 }
 0x3c4   :  { %2507 = vst [vmem:[%s4211_s7 + $0xd8] sm:$0xff] %v2475_v51  ;;  %v2476_v1 = vmax.f32 %v2440_v61, 0.0  ;;  %v2442_v13 = vadd.f32 %v2441_v18, %v4074_v24 }
 0x3c5   :  { %v2443_v60 = vpop.f32.mrf.mxu1 }
 0x3c6   :  { %2508 = vst [vmem:[%s4211_s7 + $0xe0] sm:$0xff] %v2476_v1  ;;  %v2477_v46 = vmax.f32 %v2442_v13, 0.0  ;;  %v2444_v5 = vadd.f32 %v2443_v60, %v4070_v32 }
 0x3c7   :  { %v2445_v49 = vpop.f32.mrf.mxu1 }
 0x3c8   :  { %2509 = vst [vmem:[%s4211_s7 + $0xe8] sm:$0xff] %v2477_v46  ;;  %v2478_v2 = vmax.f32 %v2444_v5, 0.0  ;;  %v2446_v52 = vadd.f32 %v2445_v49, %v4074_v24 }
 0x3ca   :  { %2510 = vst [vmem:[%s4211_s7 + $0xf0] sm:$0xff] %v2478_v2  ;;  %v2479_v62 = vmax.f32 %v2446_v52, 0.0 }
 0x3cc   :  { %2511 = vst [vmem:[%s4211_s7 + $0xf8] sm:$0xff] %v2479_v62 }

</bundles_post_ra>
